<compile_context>
chip_gen: v6e
topology: v6e:2x2x1
jax: 0.10.0
libtpu: 0.0.40
codegen_flags: <defaults>
</compile_context>

<pallas_src>
from functools import partial

import jax
import jax.numpy as jnp
from jax import lax
from jax.experimental import pallas as pl
from jax.experimental.pallas import tpu as pltpu

LEAKY_SLOPE = 0.1
BN_EPS = 1e-5
LANE = 128
_VMEM_BUDGET = 20 * 1024 * 1024          # per-step working set target (fits every gen)
_VMEM_LIMIT = 32 * 1024 * 1024           # raise v5e's 16 MiB scoped default; < v7x physical


def _round_up(v, m):
    return ((v + m - 1) // m) * m


def _vmem_bytes(bh, W, Wp, Cin, Cmid, Cout, isz):
    """Rough tiled-VMEM footprint of one grid step (double-buffered blocks + values)."""
    cin_l, cmid_l, cout_l = _round_up(Cin, LANE), _round_up(Cmid, LANE), _round_up(Cout, LANE)
    wp_s = _round_up(Wp, 16)
    x_dbl = 2 * (bh + 16) * wp_s * cin_l * isz          # main block + 2-row halo, 2 buffers
    o_dbl = 2 * bh * W * cout_l * 4                     # f32 output block, 2 buffers
    weights = 9 * Cin * cmid_l * isz + _round_up(Cmid, 16) * cout_l * isz
    values = 2 * bh * W * (cmid_l * 4 + cin_l * isz)    # f32 accumulator + live tap operand
    return x_dbl + o_dbl + weights + values


def _pick_block_rows(N, H, W, Cin, Cmid, Cout, isz):
    """Row-block height: multiple of 8, VMEM-budgeted, and enough grid steps to pipeline."""
    best = 8
    for cand in range(min(64, _round_up(H, 8)), 7, -8):
        if _vmem_bytes(cand, W, W + 2, Cin, Cmid, Cout, isz) <= _VMEM_BUDGET:
            best = cand
            break
    # prefer >= ~8 grid steps (pipelining + megacore) as long as blocks stay >= 8 rows
    while best > 8 and N * ((H + best - 1) // best) < 8:
        best -= 8
    return best


def _head_kernel(halo_ref, x_ref, w1_ref, shift_ref, w2_ref, b2_ref, o_ref):
    # halo_ref:  (1, 2, Wp, Cin)   padded rows [i*bh, i*bh+2) of this image
    # x_ref:     (bh, Wp, Cin)     padded rows [i*bh+2, i*bh+bh+2)
    # w1_ref:    (9, Cin, Cmid)    3x3 conv weights, tap-major, BN scale folded in
    # shift_ref: (1, Cmid)         folded BN shift = beta - mean*gamma/sqrt(var+eps)
    # w2_ref:    (Cmid, Cout)      1x1 conv weights (unpadded)
    # b2_ref:    (1, Cout)         1x1 conv bias
    # o_ref:     (bh*W, Cout)      unpadded f32 output block
    bh, Wp, cin = x_ref.shape
    W = Wp - 2

    # (bh+2, Wp, Cin) window = top halo + body rows (concat along the untiled leading dim)
    rows = jnp.concatenate([halo_ref[0], x_ref[...]], axis=0)

    # 3x3 conv as 9 accumulating dots on shifted VMEM views (im2col stays in VMEM).
    acc = None
    for t in range(9):
        ky, kx = divmod(t, 3)
        tap = rows[ky:ky + bh, kx:kx + W, :].reshape(bh * W, cin)
        d = jnp.dot(tap, w1_ref[t], preferred_element_type=jnp.float32)
        acc = d if acc is None else acc + d

    y = acc + shift_ref[...]                                    # BN (scale already in w1)
    y = jnp.maximum(y, LEAKY_SLOPE * y)                         # LeakyReLU(0.1)
    z = jnp.dot(y.astype(w2_ref.dtype), w2_ref[...],
                preferred_element_type=jnp.float32) + b2_ref[...]
    o_ref[...] = z.astype(o_ref.dtype)


@partial(jax.jit, static_argnames=("compute_dtype",))
def head_forward(x_nchw, params, compute_dtype=jnp.bfloat16):
    """Pallas implementation of head.forward. Input/output are NCHW like PyTorch.

    compute_dtype=bfloat16 (default) halves activation/weight HBM bytes and doubles MXU
    rate; accumulation is f32.  Pass jnp.float32 for bit-tight agreement with PyTorch.
    """
    w1, gamma, beta, rmean, rvar, w2, b2 = params
    N, Cin, H, W = x_nchw.shape
    Cmid = w1.shape[0]
    Cout = w2.shape[0]
    Wp = W + 2
    isz = jnp.dtype(compute_dtype).itemsize

    bh = _pick_block_rows(N, H, W, Cin, Cmid, Cout, isz)
    Hb = -(-H // bh)                       # row blocks per image
    H_pad = Hb * bh

    # ---- layout conversion + halo construction (plain JAX, ~1x|x| of traffic) ----
    x = jnp.transpose(x_nchw, (0, 2, 3, 1)).astype(compute_dtype)          # NHWC, bf16
    # Main rows for block i are padded rows [i*bh+2, i*bh+bh+2)  == real rows 1.. then 0s.
    xmain = jnp.pad(x[:, 1:, :, :], ((0, 0), (0, H_pad - (H - 1)), (1, 1), (0, 0)))
    xmain = xmain.reshape(N * H_pad, Wp, Cin)
    # Halo rows for block i are padded rows [i*bh, i*bh+2): 2 rows per block.
    phead = jnp.pad(x, ((0, 0), (1, max(0, H_pad - 1 - H)), (1, 1), (0, 0)))[:, :H_pad]
    halo = phead.reshape(N, Hb, bh, Wp, Cin)[:, :, :2].reshape(N * Hb, 2, Wp, Cin)

    # ---- parameter folding (BN scale into conv weights) ----
    inv_std = gamma / jnp.sqrt(rvar + BN_EPS)
    w1t = jnp.transpose(w1, (2, 3, 1, 0)).reshape(9, Cin, Cmid)            # (tap, cin, cmid)
    w1f = (w1t * inv_std[None, None, :]).astype(compute_dtype)
    shift = (beta - rmean * inv_std).reshape(1, Cmid).astype(jnp.float32)
    w2m = jnp.transpose(w2.reshape(Cout, Cmid), (1, 0)).astype(compute_dtype)  # (Cmid, Cout)
    b2m = b2.reshape(1, Cout).astype(jnp.float32)

    M_total = N * H_pad * W
    cost = pl.CostEstimate(
        flops=2 * M_total * (9 * Cin * Cmid + Cmid * Cout),
        transcendentals=0,
        bytes_accessed=(xmain.size + halo.size + w1f.size + w2m.size) * isz
                       + (shift.size + b2m.size) * 4 + M_total * Cout * 4,
    )

    out = pl.pallas_call(
        _head_kernel,
        out_shape=jax.ShapeDtypeStruct((M_total, Cout), jnp.float32),
        grid=(N, Hb),
        in_specs=[
            pl.BlockSpec((1, 2, Wp, Cin), lambda n, i: (n * Hb + i, 0, 0, 0)),
            pl.BlockSpec((bh, Wp, Cin), lambda n, i: (n * Hb + i, 0, 0)),
            pl.BlockSpec((9, Cin, Cmid), lambda n, i: (0, 0, 0)),
            pl.BlockSpec((1, Cmid), lambda n, i: (0, 0)),
            pl.BlockSpec((Cmid, Cout), lambda n, i: (0, 0)),
            pl.BlockSpec((1, Cout), lambda n, i: (0, 0)),
        ],
        out_specs=pl.BlockSpec((bh * W, Cout), lambda n, i: (n * Hb + i, 0)),
        compiler_params=pltpu.CompilerParams(
            dimension_semantics=("parallel", "parallel"),
            vmem_limit_bytes=_VMEM_LIMIT),
        cost_estimate=cost,
    )(halo, xmain, w1f, shift, w2m, b2m)

    out = out.reshape(N, H_pad, W, Cout)[:, :H]                  # drop row padding (if any)
    return jnp.transpose(out, (0, 3, 1, 2))                      # back to NCHW


def _reference(x_nchw, params):
    """Pure-JAX reference reproducing the PyTorch forward (eval-mode BN)."""
    w1, gamma, beta, rmean, rvar, w2, b2 = params
    y = lax.conv_general_dilated(
        x_nchw, w1, window_strides=(1, 1), padding=((1, 1), (1, 1)),
        dimension_numbers=("NCHW", "OIHW", "NCHW"))
    inv_std = gamma / jnp.sqrt(rvar + BN_EPS)
    y = y * inv_std[None, :, None, None] + (beta - rmean * inv_std)[None, :, None, None]
    y = jnp.where(y > 0, y, LEAKY_SLOPE * y)
    z = lax.conv_general_dilated(
        y, w2, window_strides=(1, 1), padding=((0, 0), (0, 0)),
        dimension_numbers=("NCHW", "OIHW", "NCHW"))
    return z + b2[None, :, None, None]


def _init_params(key, cin, cout):
    cmid = 2 * cin
    ks = jax.random.split(key, 5)
    w1 = jax.random.normal(ks[0], (cmid, cin, 3, 3), jnp.float32) * 0.1   # 3x3 conv, no bias
    gamma = 1.0 + 0.1 * jax.random.normal(ks[1], (cmid,), jnp.float32)    # BN weight
    beta = 0.1 * jax.random.normal(ks[2], (cmid,), jnp.float32)           # BN bias
    rmean = 0.05 * jnp.arange(cmid, dtype=jnp.float32)                    # BN running mean
    rvar = 1.0 + 0.02 * jnp.arange(cmid, dtype=jnp.float32)               # BN running var
    w2 = jax.random.normal(ks[3], (cout, cmid, 1, 1), jnp.float32) * 0.1  # 1x1 conv
    b2 = 0.1 * jax.random.normal(ks[4], (cout,), jnp.float32)             # 1x1 conv bias
    return (w1, gamma, beta, rmean, rvar, w2, b2)


if __name__ == "__main__":
    key = jax.random.PRNGKey(0)
    k_x, k_p = jax.random.split(key)

    N, Cin, H, W = 2, 4, 16, 16
    Cout = 8
    x = jax.random.normal(k_x, (N, Cin, H, W), jnp.float32)   # NCHW like PyTorch
    params = _init_params(k_p, Cin, Cout)

    ref = _reference(x, params)

    # Tight check with f32 compute path.
    out_f32 = jax.block_until_ready(head_forward(x, params, compute_dtype=jnp.float32))
    assert out_f32.shape == (N, Cout, H, W), out_f32.shape
    assert jnp.allclose(out_f32, ref, atol=1e-4, rtol=1e-4), \
        float(jnp.max(jnp.abs(out_f32 - ref)))

    # Default (bf16-compute) path: looser tolerance due to bf16 input/weight rounding.
    out = jax.block_until_ready(head_forward(x, params))
    assert out.shape == (N, Cout, H, W), out.shape
    assert jnp.allclose(out, ref, atol=1e-1, rtol=5e-2), \
        float(jnp.max(jnp.abs(out - ref)))

    print("KERNEL_OK")
</pallas_src>

<mosaic_0001>
module attributes {stable_mosaic.version = 11 : i64} {
  func.func @_head_kernel(%arg0: i32, %arg1: i32, %arg2: memref<1x2x18x4xf32, #tpu.memory_space<vmem>>, %arg3: memref<8x18x4xf32, #tpu.memory_space<vmem>>, %arg4: memref<9x4x8xf32, #tpu.memory_space<vmem>>, %arg5: memref<1x8xf32, #tpu.memory_space<vmem>>, %arg6: memref<8x8xf32, #tpu.memory_space<vmem>>, %arg7: memref<1x8xf32, #tpu.memory_space<vmem>>, %arg8: memref<128x8xf32, #tpu.memory_space<vmem>>) attributes {dimension_semantics = [#tpu.dimension_semantics<parallel>, #tpu.dimension_semantics<parallel>], iteration_bounds = array<i64: 2, 2>, scalar_prefetch = 0 : i64, scratch_operands = 0 : i64, tpu.core_type = #tpu.core_type<tc>, window_params = [{transform_indices = @transform_0, window_bounds = array<i64: 1, 2, 18, 4>}, {transform_indices = @transform_1, window_bounds = array<i64: 8, 18, 4>}, {pipeline_mode = #tpu.pipeline_mode<synchronous>, transform_indices = @transform_2, window_bounds = array<i64: 9, 4, 8>}, {pipeline_mode = #tpu.pipeline_mode<synchronous>, transform_indices = @transform_3, window_bounds = array<i64: 1, 8>}, {pipeline_mode = #tpu.pipeline_mode<synchronous>, transform_indices = @transform_4, window_bounds = array<i64: 8, 8>}, {pipeline_mode = #tpu.pipeline_mode<synchronous>, transform_indices = @transform_5, window_bounds = array<i64: 1, 8>}, {transform_indices = @transform_6, window_bounds = array<i64: 128, 8>}]} {
    %c0 = arith.constant 0 : index
    %c0_0 = arith.constant 0 : index
    %c0_1 = arith.constant 0 : index
    %c0_2 = arith.constant 0 : index
    %0 = vector.load %arg2[%c0, %c0_0, %c0_1, %c0_2] : memref<1x2x18x4xf32, #tpu.memory_space<vmem>>, vector<1x2x18x4xf32>
    %1 = vector.shape_cast %0 : vector<1x2x18x4xf32> to vector<2x18x4xf32>
    %c0_3 = arith.constant 0 : index
    %c0_4 = arith.constant 0 : index
    %c0_5 = arith.constant 0 : index
    %2 = vector.load %arg3[%c0_3, %c0_4, %c0_5] : memref<8x18x4xf32, #tpu.memory_space<vmem>>, vector<8x18x4xf32>
    %3 = tpu.concatenate %1, %2 in 0 : vector<2x18x4xf32>, vector<8x18x4xf32> -> vector<10x18x4xf32>
    %4 = vector.extract_strided_slice %3 {offsets = [0, 0, 0], sizes = [8, 16, 4], strides = [1, 1, 1]} : vector<10x18x4xf32> to vector<8x16x4xf32>
    %5 = vector.shape_cast %4 : vector<8x16x4xf32> to vector<128x4xf32>
    %c0_6 = arith.constant 0 : index
    %c0_7 = arith.constant 0 : index
    %c0_8 = arith.constant 0 : index
    %6 = vector.load %arg4[%c0_6, %c0_7, %c0_8] : memref<9x4x8xf32, #tpu.memory_space<vmem>>, vector<1x4x8xf32>
    %7 = vector.shape_cast %6 : vector<1x4x8xf32> to vector<4x8xf32>
    %cst = arith.constant dense<0.000000e+00> : vector<128x8xf32>
    %8 = tpu.matmul %5, %7, %cst {dimension_numbers = #tpu.dot_dimension_numbers<[1], [0], [0], [1], [0, 0, 1, 1], [], []>} : vector<128x4xf32>, vector<4x8xf32>, vector<128x8xf32> -> vector<128x8xf32>
    %9 = vector.extract_strided_slice %3 {offsets = [0, 1, 0], sizes = [8, 16, 4], strides = [1, 1, 1]} : vector<10x18x4xf32> to vector<8x16x4xf32>
    %10 = vector.shape_cast %9 : vector<8x16x4xf32> to vector<128x4xf32>
    %c1 = arith.constant 1 : index
    %c0_9 = arith.constant 0 : index
    %c0_10 = arith.constant 0 : index
    %11 = vector.load %arg4[%c1, %c0_9, %c0_10] : memref<9x4x8xf32, #tpu.memory_space<vmem>>, vector<1x4x8xf32>
    %12 = vector.shape_cast %11 : vector<1x4x8xf32> to vector<4x8xf32>
    %cst_11 = arith.constant dense<0.000000e+00> : vector<128x8xf32>
    %13 = tpu.matmul %10, %12, %cst_11 {dimension_numbers = #tpu.dot_dimension_numbers<[1], [0], [0], [1], [0, 0, 1, 1], [], []>} : vector<128x4xf32>, vector<4x8xf32>, vector<128x8xf32> -> vector<128x8xf32>
    %14 = arith.addf %8, %13 : vector<128x8xf32>
    %15 = vector.extract_strided_slice %3 {offsets = [0, 2, 0], sizes = [8, 16, 4], strides = [1, 1, 1]} : vector<10x18x4xf32> to vector<8x16x4xf32>
    %16 = vector.shape_cast %15 : vector<8x16x4xf32> to vector<128x4xf32>
    %c2 = arith.constant 2 : index
    %c0_12 = arith.constant 0 : index
    %c0_13 = arith.constant 0 : index
    %17 = vector.load %arg4[%c2, %c0_12, %c0_13] : memref<9x4x8xf32, #tpu.memory_space<vmem>>, vector<1x4x8xf32>
    %18 = vector.shape_cast %17 : vector<1x4x8xf32> to vector<4x8xf32>
    %cst_14 = arith.constant dense<0.000000e+00> : vector<128x8xf32>
    %19 = tpu.matmul %16, %18, %cst_14 {dimension_numbers = #tpu.dot_dimension_numbers<[1], [0], [0], [1], [0, 0, 1, 1], [], []>} : vector<128x4xf32>, vector<4x8xf32>, vector<128x8xf32> -> vector<128x8xf32>
    %20 = arith.addf %14, %19 : vector<128x8xf32>
    %21 = vector.extract_strided_slice %3 {offsets = [1, 0, 0], sizes = [8, 16, 4], strides = [1, 1, 1]} : vector<10x18x4xf32> to vector<8x16x4xf32>
    %22 = vector.shape_cast %21 : vector<8x16x4xf32> to vector<128x4xf32>
    %c3 = arith.constant 3 : index
    %c0_15 = arith.constant 0 : index
    %c0_16 = arith.constant 0 : index
    %23 = vector.load %arg4[%c3, %c0_15, %c0_16] : memref<9x4x8xf32, #tpu.memory_space<vmem>>, vector<1x4x8xf32>
    %24 = vector.shape_cast %23 : vector<1x4x8xf32> to vector<4x8xf32>
    %cst_17 = arith.constant dense<0.000000e+00> : vector<128x8xf32>
    %25 = tpu.matmul %22, %24, %cst_17 {dimension_numbers = #tpu.dot_dimension_numbers<[1], [0], [0], [1], [0, 0, 1, 1], [], []>} : vector<128x4xf32>, vector<4x8xf32>, vector<128x8xf32> -> vector<128x8xf32>
    %26 = arith.addf %20, %25 : vector<128x8xf32>
    %27 = vector.extract_strided_slice %3 {offsets = [1, 1, 0], sizes = [8, 16, 4], strides = [1, 1, 1]} : vector<10x18x4xf32> to vector<8x16x4xf32>
    %28 = vector.shape_cast %27 : vector<8x16x4xf32> to vector<128x4xf32>
    %c4 = arith.constant 4 : index
    %c0_18 = arith.constant 0 : index
    %c0_19 = arith.constant 0 : index
    %29 = vector.load %arg4[%c4, %c0_18, %c0_19] : memref<9x4x8xf32, #tpu.memory_space<vmem>>, vector<1x4x8xf32>
    %30 = vector.shape_cast %29 : vector<1x4x8xf32> to vector<4x8xf32>
    %cst_20 = arith.constant dense<0.000000e+00> : vector<128x8xf32>
    %31 = tpu.matmul %28, %30, %cst_20 {dimension_numbers = #tpu.dot_dimension_numbers<[1], [0], [0], [1], [0, 0, 1, 1], [], []>} : vector<128x4xf32>, vector<4x8xf32>, vector<128x8xf32> -> vector<128x8xf32>
    %32 = arith.addf %26, %31 : vector<128x8xf32>
    %33 = vector.extract_strided_slice %3 {offsets = [1, 2, 0], sizes = [8, 16, 4], strides = [1, 1, 1]} : vector<10x18x4xf32> to vector<8x16x4xf32>
    %34 = vector.shape_cast %33 : vector<8x16x4xf32> to vector<128x4xf32>
    %c5 = arith.constant 5 : index
    %c0_21 = arith.constant 0 : index
    %c0_22 = arith.constant 0 : index
    %35 = vector.load %arg4[%c5, %c0_21, %c0_22] : memref<9x4x8xf32, #tpu.memory_space<vmem>>, vector<1x4x8xf32>
    %36 = vector.shape_cast %35 : vector<1x4x8xf32> to vector<4x8xf32>
    %cst_23 = arith.constant dense<0.000000e+00> : vector<128x8xf32>
    %37 = tpu.matmul %34, %36, %cst_23 {dimension_numbers = #tpu.dot_dimension_numbers<[1], [0], [0], [1], [0, 0, 1, 1], [], []>} : vector<128x4xf32>, vector<4x8xf32>, vector<128x8xf32> -> vector<128x8xf32>
    %38 = arith.addf %32, %37 : vector<128x8xf32>
    %39 = vector.extract_strided_slice %3 {offsets = [2, 0, 0], sizes = [8, 16, 4], strides = [1, 1, 1]} : vector<10x18x4xf32> to vector<8x16x4xf32>
    %40 = vector.shape_cast %39 : vector<8x16x4xf32> to vector<128x4xf32>
    %c6 = arith.constant 6 : index
    %c0_24 = arith.constant 0 : index
    %c0_25 = arith.constant 0 : index
    %41 = vector.load %arg4[%c6, %c0_24, %c0_25] : memref<9x4x8xf32, #tpu.memory_space<vmem>>, vector<1x4x8xf32>
    %42 = vector.shape_cast %41 : vector<1x4x8xf32> to vector<4x8xf32>
    %cst_26 = arith.constant dense<0.000000e+00> : vector<128x8xf32>
    %43 = tpu.matmul %40, %42, %cst_26 {dimension_numbers = #tpu.dot_dimension_numbers<[1], [0], [0], [1], [0, 0, 1, 1], [], []>} : vector<128x4xf32>, vector<4x8xf32>, vector<128x8xf32> -> vector<128x8xf32>
    %44 = arith.addf %38, %43 : vector<128x8xf32>
    %45 = vector.extract_strided_slice %3 {offsets = [2, 1, 0], sizes = [8, 16, 4], strides = [1, 1, 1]} : vector<10x18x4xf32> to vector<8x16x4xf32>
    %46 = vector.shape_cast %45 : vector<8x16x4xf32> to vector<128x4xf32>
    %c7 = arith.constant 7 : index
    %c0_27 = arith.constant 0 : index
    %c0_28 = arith.constant 0 : index
    %47 = vector.load %arg4[%c7, %c0_27, %c0_28] : memref<9x4x8xf32, #tpu.memory_space<vmem>>, vector<1x4x8xf32>
    %48 = vector.shape_cast %47 : vector<1x4x8xf32> to vector<4x8xf32>
    %cst_29 = arith.constant dense<0.000000e+00> : vector<128x8xf32>
    %49 = tpu.matmul %46, %48, %cst_29 {dimension_numbers = #tpu.dot_dimension_numbers<[1], [0], [0], [1], [0, 0, 1, 1], [], []>} : vector<128x4xf32>, vector<4x8xf32>, vector<128x8xf32> -> vector<128x8xf32>
    %50 = arith.addf %44, %49 : vector<128x8xf32>
    %51 = vector.extract_strided_slice %3 {offsets = [2, 2, 0], sizes = [8, 16, 4], strides = [1, 1, 1]} : vector<10x18x4xf32> to vector<8x16x4xf32>
    %52 = vector.shape_cast %51 : vector<8x16x4xf32> to vector<128x4xf32>
    %c8 = arith.constant 8 : index
    %c0_30 = arith.constant 0 : index
    %c0_31 = arith.constant 0 : index
    %53 = vector.load %arg4[%c8, %c0_30, %c0_31] : memref<9x4x8xf32, #tpu.memory_space<vmem>>, vector<1x4x8xf32>
    %54 = vector.shape_cast %53 : vector<1x4x8xf32> to vector<4x8xf32>
    %cst_32 = arith.constant dense<0.000000e+00> : vector<128x8xf32>
    %55 = tpu.matmul %52, %54, %cst_32 {dimension_numbers = #tpu.dot_dimension_numbers<[1], [0], [0], [1], [0, 0, 1, 1], [], []>} : vector<128x4xf32>, vector<4x8xf32>, vector<128x8xf32> -> vector<128x8xf32>
    %56 = arith.addf %50, %55 : vector<128x8xf32>
    %c0_33 = arith.constant 0 : index
    %c0_34 = arith.constant 0 : index
    %57 = vector.load %arg5[%c0_33, %c0_34] : memref<1x8xf32, #tpu.memory_space<vmem>>, vector<1x8xf32>
    %58 = vector.broadcast %57 : vector<1x8xf32> to vector<128x8xf32>
    %59 = arith.addf %56, %58 : vector<128x8xf32>
    %cst_35 = arith.constant 1.000000e-01 : f32
    %60 = vector.broadcast %cst_35 : f32 to vector<128x8xf32>
    %61 = arith.mulf %60, %59 : vector<128x8xf32>
    %62 = arith.maximumf %59, %61 : vector<128x8xf32>
    %c0_36 = arith.constant 0 : index
    %c0_37 = arith.constant 0 : index
    %63 = vector.load %arg6[%c0_36, %c0_37] : memref<8x8xf32, #tpu.memory_space<vmem>>, vector<8x8xf32>
    %cst_38 = arith.constant dense<0.000000e+00> : vector<128x8xf32>
    %64 = tpu.matmul %62, %63, %cst_38 {dimension_numbers = #tpu.dot_dimension_numbers<[1], [0], [0], [1], [0, 0, 1, 1], [], []>} : vector<128x8xf32>, vector<8x8xf32>, vector<128x8xf32> -> vector<128x8xf32>
    %c0_39 = arith.constant 0 : index
    %c0_40 = arith.constant 0 : index
    %65 = vector.load %arg7[%c0_39, %c0_40] : memref<1x8xf32, #tpu.memory_space<vmem>>, vector<1x8xf32>
    %66 = vector.broadcast %65 : vector<1x8xf32> to vector<128x8xf32>
    %67 = arith.addf %64, %66 : vector<128x8xf32>
    %c0_41 = arith.constant 0 : index
    %c0_42 = arith.constant 0 : index
    %68 = vector.load %arg8[%c0_41, %c0_42] : memref<128x8xf32, #tpu.memory_space<vmem>>, vector<128x8xf32>
    tpu.vector_store %arg8[%c0_41, %c0_42], %67 {strides = array<i32>} : memref<128x8xf32, #tpu.memory_space<vmem>>, vector<128x8xf32>,
    return
  }
  func.func @transform_0(%arg0: i32, %arg1: i32) -> (i32, i32, i32, i32) {
    %c2_i32 = arith.constant 2 : i32
    %0 = arith.muli %arg0, %c2_i32 : i32
    %1 = arith.addi %0, %arg1 : i32
    %c0_i32 = arith.constant 0 : i32
    %c0_i32_0 = arith.constant 0 : i32
    %c0_i32_1 = arith.constant 0 : i32
    %c0_i32_2 = arith.constant 0 : i32
    return %1, %c0_i32, %c0_i32_0, %c0_i32_1 : i32, i32, i32, i32
  }
  func.func @transform_1(%arg0: i32, %arg1: i32) -> (i32, i32, i32) {
    %c2_i32 = arith.constant 2 : i32
    %0 = arith.muli %arg0, %c2_i32 : i32
    %1 = arith.addi %0, %arg1 : i32
    %c0_i32 = arith.constant 0 : i32
    %c0_i32_0 = arith.constant 0 : i32
    %c0_i32_1 = arith.constant 0 : i32
    return %1, %c0_i32, %c0_i32_0 : i32, i32, i32
  }
  func.func @transform_2(%arg0: i32, %arg1: i32) -> (i32, i32, i32) {
    %c0_i32 = arith.constant 0 : i32
    %c0_i32_0 = arith.constant 0 : i32
    %c0_i32_1 = arith.constant 0 : i32
    %c0_i32_2 = arith.constant 0 : i32
    return %c0_i32, %c0_i32_0, %c0_i32_1 : i32, i32, i32
  }
  func.func @transform_3(%arg0: i32, %arg1: i32) -> (i32, i32) {
    %c0_i32 = arith.constant 0 : i32
    %c0_i32_0 = arith.constant 0 : i32
    %c0_i32_1 = arith.constant 0 : i32
    return %c0_i32, %c0_i32_0 : i32, i32
  }
  func.func @transform_4(%arg0: i32, %arg1: i32) -> (i32, i32) {
    %c0_i32 = arith.constant 0 : i32
    %c0_i32_0 = arith.constant 0 : i32
    %c0_i32_1 = arith.constant 0 : i32
    return %c0_i32, %c0_i32_0 : i32, i32
  }
  func.func @transform_5(%arg0: i32, %arg1: i32) -> (i32, i32) {
    %c0_i32 = arith.constant 0 : i32
    %c0_i32_0 = arith.constant 0 : i32
    %c0_i32_1 = arith.constant 0 : i32
    return %c0_i32, %c0_i32_0 : i32, i32
  }
  func.func @transform_6(%arg0: i32, %arg1: i32) -> (i32, i32) {
    %c2_i32 = arith.constant 2 : i32
    %0 = arith.muli %arg0, %c2_i32 : i32
    %1 = arith.addi %0, %arg1 : i32
    %c0_i32 = arith.constant 0 : i32
    %c0_i32_0 = arith.constant 0 : i32
    return %1, %c0_i32 : i32, i32
  }
}

</mosaic_0001>

<bundles_post_ra>
// kernel: head_forward.1
= control target key start
LH: loop header
LB: loop body
LE: loop exit
PB: predicated region body
PF: predicated region fallthrough
CT: control target
= control target key end

     0   :  { %s3179_s21 = smov 0   ;;  %s3181_s22 = smov 0   ;;  %s4128_s0 = inlined_call_operand.vmem [shape: f32[4,2,18,4], index: 0, kind: input, shape index: {}]   ;;  %s4129_s1 = inlined_call_operand.vmem [shape: f32[32,18,4], index: 1, kind: input, shape index: {}]   ;;  %s4130_s2 = inlined_call_operand.vmem [shape: f32[9,4,8], index: 2, kind: input, shape index: {}]   ;;  %s4131_s3 = inlined_call_operand.vmem [shape: f32[1,8], index: 3, kind: input, shape index: {}]   ;;  %s4132_s4 = inlined_call_operand.vmem [shape: f32[8,8], index: 4, kind: input, shape index: {}]   ;;  %s4133_s5 = inlined_call_operand.vmem [shape: f32[1,8], index: 5, kind: input, shape index: {}]   ;;  %s4134_s6 = inlined_call_operand.vmem [shape: f32[512,8], index: 6, kind: output, shape index: {}]  }
   0x1   :  { %s3183_s23 = smov 0   ;;  %s3185_s24 = smov 0  }
   0x2   :  { %s3187_s25 = smov 0  }
   0x3 LB: > { %s25_s26 = sadd.s32 1, %s3134_s23  ;;  %s28_s27 = sadd.s32 1, %s3138_s24  ;;  %s3142_s25 = sphi %s3187_s25, %s16_s25   ;;  %s3138_s24 = sphi %s3185_s24, %s4194_s24   ;;  %s3134_s23 = sphi %s3183_s23, %s4193_s23   ;;  %s3130_s22 = sphi %s3181_s22, %s4192_s22   ;;  %s3126_s21 = sphi %s3179_s21, %s4191_s21  }
   0x4   : > { %p26_p0 = scmp.ge.s32.totalorder %s25_s26, 2  ;;  %p2442_p1 = scmp.ge.s32.totalorder %s3142_s25, 1 }
   0x5   : > { %p256_p2 = scmp.lt.s32.totalorder %s3142_s25, 5 }
   0x6   : > { %s4196_s26 = smov (%p26_p0, %s25_s26), 0  ;;  %s4198_s27 = smov (!%p26_p0, %s28_s27), %s3138_s24 }
   0x7   : > { %p257_p3 = pnand %p2442_p1, %p256_p2  ;;  %p30_p4 = scmp.ge.s32.totalorder %s4198_s27, 2 }
   0x9   : > { %s4200_s27 = smov (%p30_p4, %s4198_s27), 0  ;;  %260 = sbr.rel (%p257_p3) target bundleno = 586 (0x24a), region = 44 }
   0xe   : > { %v2451_v0 = vld [vmem:[%s4130_s2 + $0x4] sm:$0xf]  ;;  %vm459_vm0 = vcmask 1043456   ;;  %v358_v1 = vld [vmem:[%s4130_s2] sm:$0xf]  ;;  %s2443_s8 = sshll.u32 %s3130_s22, 1 }
   0xf   : > { %2802 = vmatprep.subr.msk.mxu0 %vm459_vm0, %v2451_v0  ;;  %2828 = vmatprep.subr.msk.mxu1 %vm459_vm0, %v358_v1  ;;  %s3217_s9 = sadd.s32 %s3126_s21, %s2443_s8  ;;  %v2486_v2 = vld [vmem:[%s4130_s2 + $0x8] sm:$0xf]  ;;  %v2504_v3 = vld [vmem:[%s4130_s2 + $0xc] sm:$0xf]  ;;  %vm426_vm1 = vcmask 31744   ;;  %vm383_vm2 = vcmask 1046528  }
  0x10   : > { %2803 = vmatpush3.msk.msra.mxu0 %vm459_vm0, %v2451_v0  ;;  %p300_p5 = scmp.lt.s32.totalorder %s3217_s9, 3  ;;  %s2446_s14 = sshll.u32 %s3217_s9, 3  ;;  %2829 = vmatpush3.msk.msra.mxu1 %vm459_vm0, %v358_v1  ;;  %v3256_v11 = vld [vmem:[%s4130_s2 + $0x14] sm:$0xf]  ;;  %v3293_v26 = vld [vmem:[%s4130_s2 + $0x10] sm:$0xf] }
  0x11   : > { %p310_p6 = scmp.lt.s32.totalorder %s2446_s14, 31  ;;  %2854 = vmatprep.subr.msk.mxu0 %vm459_vm0, %v2486_v2  ;;  %2880 = vmatprep.subr.msk.mxu1 %vm459_vm0, %v2504_v3  ;;  %vm788_vm3 = vcmask 1045504   ;;  %vm2136_vm4 = vcmask 64512  }
  0x12   : > { %s301_s15 = scalar_select %p300_p5, %s3217_s9, 3 }
  0x13   : > { %s4202_s14 = smov (!%p310_p6, %s2446_s14), 31 }
  0x14   : > { %s3062_s16 = smul.u32 48, %s301_s15 }
  0x15   : > { %s3063_s17 = smul.u32 24, %s4202_s14 }
  0x16   : > { %s304_s20 = scalar_lea.vmem %s4128_s0, %s3062_s16 }
  0x17   : > { %s3238_s28 = scalar_lea.vmem %s4129_s1, %s3063_s17  ;;  %v3240_v4 = vld [vmem:[%s304_s20] sm:$0xff]  ;;  %v3242_v5 = vld [vmem:[%s304_s20 + $0x8] sm:$0xff]  ;;  %v3244_v6 = vld [vmem:[%s304_s20 + $0x10] sm:$0x3] }
  0x18   : > { %v384_v7 = vrot.slane %v3240_v4, 1  ;;  %v385_v8 = vrot.slane %v3242_v5, 1  ;;  %2830 = vmatprep.mubr.msk.f32.mxu1 %vm426_vm1, %v3240_v4  ;;  %v387_v9 = vrot.slane %v3244_v6, 1  ;;  %v3251_v10 = vld [vmem:[%s304_s20 + $0x18] sm:$0xff]  ;;  %v3260_v12 = vld [vmem:[%s304_s20 + $0x20] sm:$0xff]  ;;  %v3275_v20 = vld [vmem:[%s3238_s28 + $0x8] sm:$0xff] }
  0x19   : > { %2831 = vmatmul.mubr.msk.f32.vlgmr.msra.gmra.mxu1 %vm426_vm1, %v3242_v5  ;;  %v389_v13 = vrot.slane %v3251_v10, 1  ;;  %v3263_v14 = vld [vmem:[%s304_s20 + $0x28] sm:$0x3]  ;;  %v3266_v15 = vld [vmem:[%s3238_s28] sm:$0xff]  ;;  %v390_v18 = vrot.slane %v3260_v12, 1  ;;  %v395_v23 = vrot.slane %v3275_v20, 1 }
  0x1a   : > { %v386_v16 = vsel %vm383_vm2, %v384_v7, %v385_v8  ;;  %v388_v17 = vsel %vm383_vm2, %v385_v8, %v387_v9  ;;  %2833 = vmatprep.mubr.msk.f32.mxu1 %vm426_vm1, %v3251_v10  ;;  %v392_v19 = vrot.slane %v3263_v14, 1  ;;  %v3278_v21 = vld [vmem:[%s3238_s28 + $0x10] sm:$0x3]  ;;  %2881 = vmatpush3.msk.msra.mxu1 %vm459_vm0, %v2504_v3  ;;  %v394_v22 = vrot.slane %v3266_v15, 1  ;;  %v3285_v24 = vld [vmem:[%s3238_s28 + $0x18] sm:$0xff]  ;;  %v3288_v25 = vld [vmem:[%s3238_s28 + $0x20] sm:$0xff] }
  0x1b   : > { %2804 = vmatprep.mubr.msk.f32.mxu0 %vm426_vm1, %v386_v16  ;;  %2932 = vmatprep.subr.msk.mxu1 %vm459_vm0, %v3256_v11  ;;  %v3299_v27 = vsel %vm383_vm2, %v389_v13, %v390_v18  ;;  %v397_v29 = vrot.slane %v3278_v21, 1  ;;  %v399_v31 = vrot.slane %v3285_v24, 1  ;;  %v400_v32 = vrot.slane %v3288_v25, 1  ;;  %v3316_v33 = vld [vmem:[%s3238_s28 + $0x28] sm:$0x3]  ;;  %v3323_v34 = vld [vmem:[%s3238_s28 + $0x30] sm:$0xff] }
  0x1c   : > { %2805 = vmatmul.mubr.msk.f32.vlgmr.msra.gmra.mxu0 %vm426_vm1, %v388_v17  ;;  %v3305_v28 = vsel %vm383_vm2, %v390_v18, %v392_v19  ;;  %v3311_v30 = vsel %vm383_vm2, %v394_v22, %v395_v23  ;;  %v3326_v35 = vld [vmem:[%s3238_s28 + $0x38] sm:$0xff]  ;;  %v402_v37 = vrot.slane %v3316_v33, 1  ;;  %v404_v39 = vrot.slane %v3323_v34, 1  ;;  %v3344_v41 = vld [vmem:[%s3238_s28 + $0x40] sm:$0x3]  ;;  %v3349_v42 = vld [vmem:[%s3238_s28 + $0x48] sm:$0xff] }
  0x1d   : > { %2855 = vmatpush3.msk.msra.mxu0 %vm459_vm0, %v2486_v2  ;;  %2807 = vmatprep.mubr.msk.f32.mxu0 %vm426_vm1, %v3299_v27  ;;  %v3333_v36 = vsel %vm383_vm2, %v395_v23, %v397_v29  ;;  %v3339_v38 = vsel %vm383_vm2, %v399_v31, %v400_v32  ;;  %v405_v40 = vrot.slane %v3326_v35, 1  ;;  %v3352_v43 = vld [vmem:[%s3238_s28 + $0x50] sm:$0xff]  ;;  %v407_v45 = vrot.slane %v3344_v41, 1  ;;  %v3370_v49 = vld [vmem:[%s3238_s28 + $0x58] sm:$0x3]  ;;  %v3373_v50 = vld [vmem:[%s3238_s28 + $0x60] sm:$0xff] }
  0x1e   : > { %2834 = vmatmul.mubr.msk.f32.gmra.mxu1 %vm426_vm1, %v3260_v12  ;;  %2906 = vmatprep.subr.msk.mxu0 %vm459_vm0, %v3293_v26  ;;  %v3359_v44 = vsel %vm383_vm2, %v400_v32, %v402_v37  ;;  %v409_v47 = vrot.slane %v3349_v42, 1  ;;  %v410_v48 = vrot.slane %v3352_v43, 1  ;;  %v3378_v51 = vld [vmem:[%s3238_s28 + $0x68] sm:$0xff]  ;;  %v412_v53 = vrot.slane %v3370_v49, 1  ;;  %v3396_v57 = vld [vmem:[%s3238_s28 + $0x70] sm:$0x3] }
  0x1f   : > { %2836 = vmatprep.mubr.msk.f32.mxu1 %vm426_vm1, %v3266_v15  ;;  %v3365_v46 = vsel %vm383_vm2, %v404_v39, %v405_v40  ;;  %v3385_v52 = vsel %vm383_vm2, %v405_v40, %v407_v45  ;;  %v414_v54 = vrot.slane %v3373_v50, 1  ;;  %v415_v56 = vrot.slane %v3378_v51, 1  ;;  %v3399_v58 = vld [vmem:[%s3238_s28 + $0x78] sm:$0xff]  ;;  %v3402_v59 = vld [vmem:[%s3238_s28 + $0xa0] sm:$0x3]  ;;  %v3413_v62 = vld [vmem:[%s3238_s28 + $0xa8] sm:$0xff] }
  0x20   : > { %2808 = vmatmul.mubr.msk.f32.gmra.mxu0 %vm426_vm1, %v3305_v28  ;;  %v3392_v55 = vsel %vm383_vm2, %v409_v47, %v410_v48  ;;  %v3407_v60 = vld [vmem:[%s3238_s28 + $0x80] sm:$0xff]  ;;  %v3410_v61 = vld [vmem:[%s3238_s28 + $0x98] sm:$0xff]  ;;  %v3419_v0 = vld [vmem:[%s3238_s28 + $0xb0] sm:$0xff]  ;;  %v3424_v1 = vsel %vm383_vm2, %v410_v48, %v412_v53  ;;  %v417_v2 = vrot.slane %v3396_v57, 1  ;;  %v1203_v3 = vrot.slane %v3402_v59, 1  ;;  %s2449_s20 = sshll.u32 %s3217_s9, 4 }
  0x21   : > { %2810 = vmatprep.mubr.msk.f32.mxu0 %vm426_vm1, %v3311_v30  ;;  %v1201_v63 = vrot.slane %v3410_v61, 1  ;;  %v357_v7 = vld [vmem:[%s3238_s28 + $0xb8] sm:$0x3]  ;;  %v3432_v8 = vsel %vm383_vm2, %v414_v54, %v415_v56  ;;  %v419_v9 = vrot.slane %v3399_v58, 1  ;;  %v420_v13 = vrot.slane %v3407_v60, 1  ;;  %p321_p7 = scmp.lt.s32.totalorder %s2449_s20, 63 }
  0x22   : > { %2837 = vmatmul.mubr.msk.f32.gmra.mxu1 %vm426_vm1, %v3275_v20  ;;  %v3437_v16 = vld [vmem:[%s3238_s28 + $0x88] sm:$0x3]  ;;  %v1723_v17 = vrot.slane %v3413_v62, 1  ;;  %v1724_v19 = vrot.slane %v3419_v0, 1  ;;  %v1898_v22 = vrot.slane %v3413_v62, 2  ;;  %v1899_v23 = vrot.slane %v3419_v0, 2 }
  0x23   : > { %2839 = vmatprep.mubr.msk.f32.mxu1 %vm426_vm1, %v3285_v24  ;;  %v3445_v18 = vsel %vm383_vm2, %v1201_v63, %v1203_v3  ;;  %v1726_v29 = vrot.slane %v357_v7, 1  ;;  %v3455_v31 = vsel %vm383_vm2, %v415_v56, %v417_v2  ;;  %v422_v32 = vrot.slane %v3437_v16, 1  ;;  %s4204_s20 = smov (!%p321_p7, %s2449_s20), 63 }
  0x24   : > { %2811 = vmatmul.mubr.msk.f32.gmra.mxu0 %vm426_vm1, %v3333_v36  ;;  %v3459_v37 = vsel %vm383_vm2, %v1723_v17, %v1724_v19  ;;  %v3464_v39 = vsel %vm383_vm2, %v419_v9, %v420_v13  ;;  %v789_v40 = vrot.slane %v3240_v4, 2  ;;  %v790_v45 = vrot.slane %v3242_v5, 2  ;;  %v3502_v9 = vld [vmem:[%s4130_s2 + $0x1c] sm:$0xf]  ;;  %s2450_s21 = sshll.u32 %s4204_s20, 3 }
  0x25   : > { %2813 = vmatprep.mubr.msk.f32.mxu0 %vm426_vm1, %v3339_v38  ;;  %v3469_v47 = vsel %vm383_vm2, %v1724_v19, %v1726_v29  ;;  %v3476_v48 = vsel %vm788_vm3, %v1898_v22, %v1899_v23  ;;  %v792_v53 = vrot.slane %v3244_v6, 2  ;;  %v3482_v4 = vsel %vm383_vm2, %v420_v13, %v422_v32  ;;  %s4079_s7 = scalar_lea.vmem %s4134_s6, %s2450_s21 }
  0x26   : > { %2840 = vmatmul.mubr.msk.f32.gmra.mxu1 %vm426_vm1, %v3288_v25  ;;  %v1901_v5 = vrot.slane %v357_v7, 2  ;;  %v791_v54 = vsel %vm788_vm3, %v789_v40, %v790_v45  ;;  %v794_v56 = vrot.slane %v3251_v10, 2  ;;  %v795_v2 = vrot.slane %v3260_v12, 2 }
  0x27   : > { %2842 = vmatprep.mubr.msk.f32.mxu1 %vm426_vm1, %v3323_v34  ;;  %v793_v3 = vsel %vm788_vm3, %v790_v45, %v792_v53  ;;  %v797_v7 = vrot.slane %v3263_v14, 2  ;;  %v799_v13 = vrot.slane %v3266_v15, 2  ;;  %v800_v17 = vrot.slane %v3275_v20, 2  ;;  %v3518_v14 = vld [vmem:[%s4130_s2 + $0x18] sm:$0xf] }
  0x28   : > { %2814 = vmatmul.mubr.msk.f32.gmra.mxu0 %vm426_vm1, %v3359_v44  ;;  %v3492_v6 = vsel %vm788_vm3, %v1899_v23, %v1901_v5  ;;  %v804_v22 = vrot.slane %v3285_v24, 2  ;;  %v805_v23 = vrot.slane %v3288_v25, 2  ;;  %v809_v32 = vrot.slane %v3323_v34, 2 }
  0x29   : > { %2816 = vmatprep.mubr.msk.f32.mxu0 %vm426_vm1, %v3365_v46  ;;  %v3532_v19 = vsel %vm788_vm3, %v799_v13, %v800_v17  ;;  %v810_v40 = vrot.slane %v3326_v35, 2  ;;  %v812_v45 = vrot.slane %v3344_v41, 2  ;;  %v814_v5 = vrot.slane %v3349_v42, 2 }
  0x2a   : > { %2843 = vmatmul.mubr.msk.f32.gmra.mxu1 %vm426_vm1, %v3326_v35  ;;  %v3550_v29 = vsel %vm788_vm3, %v804_v22, %v805_v23  ;;  %v822_v13 = vrot.slane %v3396_v57, 2  ;;  %v825_v22 = vrot.slane %v3407_v60, 2 }
  0x2b   : > { %2845 = vmatprep.mubr.msk.f32.mxu1 %vm426_vm1, %v3349_v42  ;;  %v3567_v53 = vsel %vm788_vm3, %v809_v32, %v810_v40  ;;  %v3578_v41 = vsel %vm788_vm3, %v810_v40, %v812_v45 }
  0x2c   : > { %2817 = vmatmul.mubr.msk.f32.gmra.mxu0 %vm426_vm1, %v3385_v52 }
  0x2d   : > { %2819 = vmatprep.mubr.msk.f32.mxu0 %vm426_vm1, %v3392_v55 }
  0x2e   : > { %2846 = vmatmul.mubr.msk.f32.gmra.mxu1 %vm426_vm1, %v3352_v43 }
  0x2f   : > { %2848 = vmatprep.mubr.msk.f32.mxu1 %vm426_vm1, %v3373_v50 }
  0x30   : > { %2820 = vmatmul.mubr.msk.f32.gmra.mxu0 %vm426_vm1, %v3424_v1 }
  0x31   : > { %2822 = vmatprep.mubr.msk.f32.mxu0 %vm426_vm1, %v3432_v8 }
  0x32   : > { %2849 = vmatmul.mubr.msk.f32.gmra.mxu1 %vm426_vm1, %v3378_v51 }
  0x33   : > { %2851 = vmatprep.mubr.msk.f32.mxu1 %vm426_vm1, %v3399_v58 }
  0x34   : > { %2823 = vmatmul.mubr.msk.f32.gmra.mxu0 %vm426_vm1, %v3455_v31 }
  0x35   : > { %2825 = vmatprep.mubr.msk.f32.mxu0 %vm426_vm1, %v3464_v39 }
  0x36   : > { %2852 = vmatmul.mubr.msk.f32.gmra.mxu1 %vm426_vm1, %v3407_v60 }
  0x37   : > { %2882 = vmatprep.mubr.msk.f32.mxu1 %vm426_vm1, %v3251_v10  ;;  %v3507_v10 = vsel %vm788_vm3, %v794_v56, %v795_v2  ;;  %v817_v56 = vrot.slane %v3370_v49, 2 }
  0x38   : > { %2826 = vmatmul.mubr.msk.f32.gmra.mxu0 %vm426_vm1, %v3482_v4 }
  0x39   : > { %2856 = vmatprep.mubr.msk.f32.mxu0 %vm426_vm1, %v791_v54  ;;  %v815_v54 = vrot.slane %v3352_v43, 2 }
  0x3a   : > { %2883 = vmatmul.mubr.msk.f32.vlgmr.msra.gmra.mxu1 %vm426_vm1, %v3260_v12  ;;  %v798_v12 = vsel %vm788_vm3, %v795_v2, %v797_v7  ;;  %v820_v7 = vrot.slane %v3378_v51, 2 }
  0x3b   : > { %2885 = vmatprep.mubr.msk.f32.mxu1 %vm426_vm1, %v3266_v15  ;;  %2933 = vmatpush3.msk.msra.mxu1 %vm459_vm0, %v3256_v11  ;;  %v802_v11 = vrot.slane %v3278_v21, 2  ;;  %v3584_v2 = vsel %vm788_vm3, %v814_v5, %v815_v54  ;;  %v3595_v49 = vsel %vm788_vm3, %v815_v54, %v817_v56 }
  0x3c   : > { %2857 = vmatmul.mubr.msk.f32.vlgmr.msra.gmra.mxu0 %vm426_vm1, %v793_v3  ;;  %2984 = vmatprep.subr.msk.mxu1 %vm459_vm0, %v3502_v9  ;;  %v819_v3 = vrot.slane %v3373_v50, 2  ;;  %v3615_v57 = vsel %vm788_vm3, %v820_v7, %v822_v13 }
  0x3d   : > { %2907 = vmatpush3.msk.msra.mxu0 %vm459_vm0, %v3293_v26  ;;  %2859 = vmatprep.mubr.msk.f32.mxu0 %vm426_vm1, %v3507_v10  ;;  %v3544_v21 = vsel %vm788_vm3, %v800_v17, %v802_v11  ;;  %v807_v26 = vrot.slane %v3316_v33, 2  ;;  %v824_v11 = vrot.slane %v3399_v58, 2 }
  0x3e   : > { %2886 = vmatmul.mubr.msk.f32.gmra.mxu1 %vm426_vm1, %v3275_v20  ;;  %2958 = vmatprep.subr.msk.mxu0 %vm459_vm0, %v3518_v14  ;;  %v3601_v17 = vsel %vm788_vm3, %v819_v3, %v820_v7 }
  0x3f   : > { %2888 = vmatprep.mubr.msk.f32.mxu1 %vm426_vm1, %v3285_v24  ;;  %v3561_v33 = vsel %vm788_vm3, %v805_v23, %v807_v26  ;;  %v3610_v23 = vld [vmem:[%s3238_s28 + $0x90] sm:$0xff]  ;;  %v827_v26 = vrot.slane %v3437_v16, 2  ;;  %v3621_v32 = vsel %vm788_vm3, %v824_v11, %v825_v22  ;;  %v2594_v16 = vld [vmem:[%s4130_s2 + $0x20] sm:$0xf] }
  0x40   : > { %2860 = vmatmul.mubr.msk.f32.gmra.mxu0 %vm426_vm1, %v798_v12 }
  0x41   : > { %2862 = vmatprep.mubr.msk.f32.mxu0 %vm426_vm1, %v3532_v19  ;;  %v3630_v40 = vsel %vm788_vm3, %v825_v22, %v827_v26 }
  0x42   : > { %2889 = vmatmul.mubr.msk.f32.gmra.mxu1 %vm426_vm1, %v3288_v25 }
  0x43   : > { %2891 = vmatprep.mubr.msk.f32.mxu1 %vm426_vm1, %v3323_v34 }
  0x44   : > { %2863 = vmatmul.mubr.msk.f32.gmra.mxu0 %vm426_vm1, %v3544_v21 }
  0x45   : > { %2865 = vmatprep.mubr.msk.f32.mxu0 %vm426_vm1, %v3550_v29 }
  0x46   : > { %2892 = vmatmul.mubr.msk.f32.gmra.mxu1 %vm426_vm1, %v3326_v35 }
  0x47   : > { %2894 = vmatprep.mubr.msk.f32.mxu1 %vm426_vm1, %v3349_v42 }
  0x48   : > { %2866 = vmatmul.mubr.msk.f32.gmra.mxu0 %vm426_vm1, %v3561_v33 }
  0x49   : > { %2868 = vmatprep.mubr.msk.f32.mxu0 %vm426_vm1, %v3567_v53 }
  0x4a   : > { %2895 = vmatmul.mubr.msk.f32.gmra.mxu1 %vm426_vm1, %v3352_v43 }
  0x4b   : > { %2897 = vmatprep.mubr.msk.f32.mxu1 %vm426_vm1, %v3373_v50 }
  0x4c   : > { %2869 = vmatmul.mubr.msk.f32.gmra.mxu0 %vm426_vm1, %v3578_v41 }
  0x4d   : > { %2871 = vmatprep.mubr.msk.f32.mxu0 %vm426_vm1, %v3584_v2 }
  0x4e   : > { %2898 = vmatmul.mubr.msk.f32.gmra.mxu1 %vm426_vm1, %v3378_v51 }
  0x4f   : > { %2900 = vmatprep.mubr.msk.f32.mxu1 %vm426_vm1, %v3399_v58 }
  0x50   : > { %2872 = vmatmul.mubr.msk.f32.gmra.mxu0 %vm426_vm1, %v3595_v49 }
  0x51   : > { %2874 = vmatprep.mubr.msk.f32.mxu0 %vm426_vm1, %v3601_v17 }
  0x52   : > { %2901 = vmatmul.mubr.msk.f32.gmra.mxu1 %vm426_vm1, %v3407_v60 }
  0x53   : > { %2903 = vmatprep.mubr.msk.f32.mxu1 %vm426_vm1, %v3610_v23 }
  0x54   : > { %2875 = vmatmul.mubr.msk.f32.gmra.mxu0 %vm426_vm1, %v3615_v57 }
  0x55   : > { %2877 = vmatprep.mubr.msk.f32.mxu0 %vm426_vm1, %v3621_v32 }
  0x56   : > { %2904 = vmatmul.mubr.msk.f32.gmra.mxu1 %vm426_vm1, %v3410_v61 }
  0x57   : > { %2934 = vmatprep.mubr.msk.f32.mxu1 %vm426_vm1, %v3507_v10  ;;  %v1378_v10 = vrot.slane %v3402_v59, 2 }
  0x58   : > { %2878 = vmatmul.mubr.msk.f32.gmra.mxu0 %vm426_vm1, %v3630_v40 }
  0x59   : > { %2908 = vmatprep.mubr.msk.f32.mxu0 %vm426_vm1, %v3299_v27  ;;  %v1375_v27 = vrot.slane %v3610_v23, 2 }
  0x5a   : > { %2935 = vmatmul.mubr.msk.f32.vlgmr.msra.gmra.mxu1 %vm426_vm1, %v798_v12 }
  0x5b   : > { %2937 = vmatprep.mubr.msk.f32.mxu1 %vm426_vm1, %v3532_v19  ;;  %2985 = vmatpush3.msk.msra.mxu1 %vm459_vm0, %v3502_v9  ;;  %v1200_v9 = vrot.slane %v3610_v23, 1 }
  0x5c   : > { %2909 = vmatmul.mubr.msk.f32.vlgmr.msra.gmra.mxu0 %vm426_vm1, %v3305_v28  ;;  %v1376_v28 = vrot.slane %v3410_v61, 2 }
  0x5d   : > { %2959 = vmatpush3.msk.msra.mxu0 %vm459_vm0, %v3518_v14  ;;  %2911 = vmatprep.mubr.msk.f32.mxu0 %vm426_vm1, %v3311_v30  ;;  %v1202_v12 = vsel %vm383_vm2, %v1200_v9, %v1201_v63 }
  0x5e   : > { %2938 = vmatmul.mubr.msk.f32.gmra.mxu1 %vm426_vm1, %v3544_v21  ;;  %3010 = vmatprep.subr.msk.mxu0 %vm459_vm0, %v2594_v16  ;;  %v1377_v14 = vsel %vm788_vm3, %v1375_v27, %v1376_v28  ;;  %v1379_v45 = vsel %vm788_vm3, %v1376_v28, %v1378_v10 }
  0x5f   : > { %2940 = vmatprep.mubr.msk.f32.mxu1 %vm426_vm1, %v3550_v29 }
  0x60   : > { %2912 = vmatmul.mubr.msk.f32.gmra.mxu0 %vm426_vm1, %v3333_v36 }
  0x61   : > { %2914 = vmatprep.mubr.msk.f32.mxu0 %vm426_vm1, %v3339_v38 }
  0x62   : > { %2941 = vmatmul.mubr.msk.f32.gmra.mxu1 %vm426_vm1, %v3561_v33 }
  0x63   : > { %2943 = vmatprep.mubr.msk.f32.mxu1 %vm426_vm1, %v3567_v53 }
  0x64   : > { %2915 = vmatmul.mubr.msk.f32.gmra.mxu0 %vm426_vm1, %v3359_v44 }
  0x65   : > { %2917 = vmatprep.mubr.msk.f32.mxu0 %vm426_vm1, %v3365_v46 }
  0x66   : > { %2944 = vmatmul.mubr.msk.f32.gmra.mxu1 %vm426_vm1, %v3578_v41 }
  0x67   : > { %2946 = vmatprep.mubr.msk.f32.mxu1 %vm426_vm1, %v3584_v2 }
  0x68   : > { %2918 = vmatmul.mubr.msk.f32.gmra.mxu0 %vm426_vm1, %v3385_v52 }
  0x69   : > { %2920 = vmatprep.mubr.msk.f32.mxu0 %vm426_vm1, %v3392_v55 }
  0x6a   : > { %2947 = vmatmul.mubr.msk.f32.gmra.mxu1 %vm426_vm1, %v3595_v49 }
  0x6b   : > { %2949 = vmatprep.mubr.msk.f32.mxu1 %vm426_vm1, %v3601_v17 }
  0x6c   : > { %2921 = vmatmul.mubr.msk.f32.gmra.mxu0 %vm426_vm1, %v3424_v1 }
  0x6d   : > { %2923 = vmatprep.mubr.msk.f32.mxu0 %vm426_vm1, %v3432_v8 }
  0x6e   : > { %2950 = vmatmul.mubr.msk.f32.gmra.mxu1 %vm426_vm1, %v3615_v57 }
  0x6f   : > { %2952 = vmatprep.mubr.msk.f32.mxu1 %vm426_vm1, %v3621_v32 }
  0x70   : > { %2924 = vmatmul.mubr.msk.f32.gmra.mxu0 %vm426_vm1, %v3455_v31 }
  0x71   : > { %2926 = vmatprep.mubr.msk.f32.mxu0 %vm426_vm1, %v3464_v39 }
  0x72   : > { %2953 = vmatmul.mubr.msk.f32.gmra.mxu1 %vm426_vm1, %v3630_v40 }
  0x73   : > { %2955 = vmatprep.mubr.msk.f32.mxu1 %vm426_vm1, %v1377_v14 }
  0x74   : > { %2927 = vmatmul.mubr.msk.f32.gmra.mxu0 %vm426_vm1, %v3482_v4 }
  0x75   : > { %2929 = vmatprep.mubr.msk.f32.mxu0 %vm426_vm1, %v1202_v12 }
  0x76   : > { %2956 = vmatmul.mubr.msk.f32.gmra.mxu1 %vm426_vm1, %v1379_v45 }
  0x77   : > { %2986 = vmatprep.mubr.msk.f32.mxu1 %vm426_vm1, %v3311_v30 }
  0x78   : > { %2930 = vmatmul.mubr.msk.f32.gmra.mxu0 %vm426_vm1, %v3445_v18 }
  0x79   : > { %2960 = vmatprep.mubr.msk.f32.mxu0 %vm426_vm1, %v3266_v15  ;;  %v2128_v15 = vld [vmem:[%s4132_s4] sm:$0xff] }
  0x7a   : > { %2987 = vmatmul.mubr.msk.f32.vlgmr.msra.gmra.mxu1 %vm426_vm1, %v3333_v36  ;;  %3036 = vmatprep.subr.mxu1 %v2128_v15 }
  0x7b   : > { %2989 = vmatprep.mubr.msk.f32.mxu1 %vm426_vm1, %v3339_v38  ;;  %3037 = vmatpush3.msra.mxu1 %v2128_v15 }
  0x7c   : > { %2961 = vmatmul.mubr.msk.f32.vlgmr.msra.gmra.mxu0 %vm426_vm1, %v3275_v20 }
  0x7d   : > { %3011 = vmatpush3.msk.msra.mxu0 %vm459_vm0, %v2594_v16  ;;  %2963 = vmatprep.mubr.msk.f32.mxu0 %vm426_vm1, %v3285_v24 }
  0x7e   : > { %2990 = vmatmul.mubr.msk.f32.gmra.mxu1 %vm426_vm1, %v3359_v44 }
  0x7f   : > { %2992 = vmatprep.mubr.msk.f32.mxu1 %vm426_vm1, %v3365_v46 }
  0x80   : > { %2964 = vmatmul.mubr.msk.f32.gmra.mxu0 %vm426_vm1, %v3288_v25 }
  0x81   : > { %2966 = vmatprep.mubr.msk.f32.mxu0 %vm426_vm1, %v3323_v34 }
  0x82   : > { %2993 = vmatmul.mubr.msk.f32.gmra.mxu1 %vm426_vm1, %v3385_v52 }
  0x83   : > { %2995 = vmatprep.mubr.msk.f32.mxu1 %vm426_vm1, %v3392_v55 }
  0x84   : > { %2967 = vmatmul.mubr.msk.f32.gmra.mxu0 %vm426_vm1, %v3326_v35 }
  0x85   : > { %2969 = vmatprep.mubr.msk.f32.mxu0 %vm426_vm1, %v3349_v42 }
  0x86   : > { %2996 = vmatmul.mubr.msk.f32.gmra.mxu1 %vm426_vm1, %v3424_v1 }
  0x87   : > { %2998 = vmatprep.mubr.msk.f32.mxu1 %vm426_vm1, %v3432_v8 }
  0x88   : > { %2970 = vmatmul.mubr.msk.f32.gmra.mxu0 %vm426_vm1, %v3352_v43 }
  0x89   : > { %2972 = vmatprep.mubr.msk.f32.mxu0 %vm426_vm1, %v3373_v50 }
  0x8a   : > { %2999 = vmatmul.mubr.msk.f32.gmra.mxu1 %vm426_vm1, %v3455_v31 }
  0x8b   : > { %3001 = vmatprep.mubr.msk.f32.mxu1 %vm426_vm1, %v3464_v39 }
  0x8c   : > { %2973 = vmatmul.mubr.msk.f32.gmra.mxu0 %vm426_vm1, %v3378_v51 }
  0x8d   : > { %2975 = vmatprep.mubr.msk.f32.mxu0 %vm426_vm1, %v3399_v58 }
  0x8e   : > { %3002 = vmatmul.mubr.msk.f32.gmra.mxu1 %vm426_vm1, %v3482_v4 }
  0x8f   : > { %3004 = vmatprep.mubr.msk.f32.mxu1 %vm426_vm1, %v1202_v12 }
  0x90   : > { %2976 = vmatmul.mubr.msk.f32.gmra.mxu0 %vm426_vm1, %v3407_v60 }
  0x91   : > { %2978 = vmatprep.mubr.msk.f32.mxu0 %vm426_vm1, %v3610_v23 }
  0x92   : > { %3005 = vmatmul.mubr.msk.f32.gmra.mxu1 %vm426_vm1, %v3445_v18 }
  0x93   : > { %3007 = vmatprep.mubr.msk.f32.mxu1 %vm426_vm1, %v3459_v37 }
  0x94   : > { %2979 = vmatmul.mubr.msk.f32.gmra.mxu0 %vm426_vm1, %v3410_v61 }
  0x95   : > { %2981 = vmatprep.mubr.msk.f32.mxu0 %vm426_vm1, %v3413_v62 }
  0x96   : > { %3008 = vmatmul.mubr.msk.f32.gmra.mxu1 %vm426_vm1, %v3469_v47 }
  0x98   : > { %2982 = vmatmul.mubr.msk.f32.gmra.mxu0 %vm426_vm1, %v3419_v0 }
  0x99   : > { %3012 = vmatprep.mubr.msk.f32.mxu0 %vm426_vm1, %v3532_v19 }
  0x9c   : > { %3013 = vmatmul.mubr.msk.f32.vlgmr.msra.gmra.mxu0 %vm426_vm1, %v3544_v21 }
  0x9d   : > { %3015 = vmatprep.mubr.msk.f32.mxu0 %vm426_vm1, %v3550_v29 }
  0xa0   : > { %3016 = vmatmul.mubr.msk.f32.gmra.mxu0 %vm426_vm1, %v3561_v33 }
  0xa1   : > { %3018 = vmatprep.mubr.msk.f32.mxu0 %vm426_vm1, %v3567_v53 }
  0xa4   : > { %3019 = vmatmul.mubr.msk.f32.gmra.mxu0 %vm426_vm1, %v3578_v41 }
  0xa5   : > { %3021 = vmatprep.mubr.msk.f32.mxu0 %vm426_vm1, %v3584_v2 }
  0xa8   : > { %3022 = vmatmul.mubr.msk.f32.gmra.mxu0 %vm426_vm1, %v3595_v49 }
  0xa9   : > { %3024 = vmatprep.mubr.msk.f32.mxu0 %vm426_vm1, %v3601_v17 }
  0xac   : > { %3025 = vmatmul.mubr.msk.f32.gmra.mxu0 %vm426_vm1, %v3615_v57 }
  0xad   : > { %3027 = vmatprep.mubr.msk.f32.mxu0 %vm426_vm1, %v3621_v32 }
  0xb0   : > { %3028 = vmatmul.mubr.msk.f32.gmra.mxu0 %vm426_vm1, %v3630_v40 }
  0xb1   : > { %3030 = vmatprep.mubr.msk.f32.mxu0 %vm426_vm1, %v1377_v14 }
  0xb4   : > { %3031 = vmatmul.mubr.msk.f32.gmra.mxu0 %vm426_vm1, %v1379_v45 }
  0xb5   : > { %3033 = vmatprep.mubr.msk.f32.mxu0 %vm426_vm1, %v3476_v48 }
  0xb8   : > { %3034 = vmatmul.mubr.msk.f32.gmra.mxu0 %vm426_vm1, %v3492_v6 }
  0xd9   : > { %v2832_v20 = vpop.f32.mrf.mxu1 }
  0xdb   : > { %v709_v24 = vpop.f32.mrf.mxu1 }
  0xdc   : > { %v2806_v25 = vpop.f32.mrf.mxu0 }
  0xdd   : > { %v715_v30 = vadd.f32 %v2832_v20, %v2806_v25 }
  0xde   : > { %v529_v34 = vpop.f32.mrf.mxu0  ;;  %v2835_v35 = vpop.f32.mrf.mxu1 }
  0xdf   : > { %v710_v36 = vadd.f32 %v709_v24, %v529_v34 }
  0xe0   : > { %v2809_v38 = vpop.f32.mrf.mxu0  ;;  %v719_v42 = vpop.f32.mrf.mxu1 }
  0xe1   : > { %v725_v43 = vadd.f32 %v2835_v35, %v2809_v38 }
  0xe2   : > { %v539_v44 = vpop.f32.mrf.mxu0  ;;  %v2838_v46 = vpop.f32.mrf.mxu1 }
  0xe3   : > { %v720_v50 = vadd.f32 %v719_v42, %v539_v44 }
  0xe4   : > { %v2812_v51 = vpop.f32.mrf.mxu0  ;;  %v729_v52 = vpop.f32.mrf.mxu1 }
  0xe5   : > { %v735_v55 = vadd.f32 %v2838_v46, %v2812_v51 }
  0xe6   : > { %v549_v58 = vpop.f32.mrf.mxu0  ;;  %v2841_v59 = vpop.f32.mrf.mxu1 }
  0xe7   : > { %v730_v60 = vadd.f32 %v729_v52, %v549_v58 }
  0xe8   : > { %v2815_v61 = vpop.f32.mrf.mxu0  ;;  %v739_v62 = vpop.f32.mrf.mxu1 }
  0xe9   : > { %v745_v63 = vadd.f32 %v2841_v59, %v2815_v61 }
  0xea   : > { %v559_v0 = vpop.f32.mrf.mxu0  ;;  %v2844_v1 = vpop.f32.mrf.mxu1 }
  0xeb   : > { %v740_v8 = vadd.f32 %v739_v62, %v559_v0 }
  0xec   : > { %v2818_v18 = vpop.f32.mrf.mxu0  ;;  %v749_v31 = vpop.f32.mrf.mxu1 }
  0xed   : > { %v755_v37 = vadd.f32 %v2844_v1, %v2818_v18 }
  0xee   : > { %v569_v39 = vpop.f32.mrf.mxu0  ;;  %v2847_v47 = vpop.f32.mrf.mxu1 }
  0xef   : > { %v750_v48 = vadd.f32 %v749_v31, %v569_v39 }
  0xf0   : > { %v2821_v4 = vpop.f32.mrf.mxu0  ;;  %v759_v6 = vpop.f32.mrf.mxu1 }
  0xf1   : > { %v765_v19 = vadd.f32 %v2847_v47, %v2821_v4 }
  0xf2   : > { %v579_v21 = vpop.f32.mrf.mxu0  ;;  %v2850_v29 = vpop.f32.mrf.mxu1 }
  0xf3   : > { %v760_v33 = vadd.f32 %v759_v6, %v579_v21 }
  0xf4   : > { %v2824_v53 = vpop.f32.mrf.mxu0  ;;  %v769_v5 = vpop.f32.mrf.mxu1 }
  0xf5   : > { %v775_v54 = vadd.f32 %v2850_v29, %v2824_v53 }
  0xf6   : > { %v589_v41 = vpop.f32.mrf.mxu0  ;;  %v2853_v56 = vpop.f32.mrf.mxu1 }
  0xf7   : > { %v770_v2 = vadd.f32 %v769_v5, %v589_v41 }
  0xf8   : > { %v2827_v3 = vpop.f32.mrf.mxu0  ;;  %v779_v7 = vpop.f32.mrf.mxu1 }
  0xf9   : > { %v785_v49 = vadd.f32 %v2853_v56, %v2827_v3 }
  0xfa   : > { %v599_v13 = vpop.f32.mrf.mxu0  ;;  %v3810_v17 = vpop.f32.mrf.mxu1 }
  0xfb   : > { %v780_v11 = vadd.f32 %v779_v7, %v599_v13 }
  0xfc   : > { %v2858_v22 = vpop.f32.mrf.mxu0  ;;  %v3812_v23 = vpop.f32.mrf.mxu1 }
  0xfd   : > { %v3814_v57 = vadd.f32 %v2858_v22, %v715_v30 }
  0xfe   : > { %v932_v26 = vpop.f32.mrf.mxu0  ;;  %v3816_v32 = vpop.f32.mrf.mxu1 }
  0xff   : > { %v3818_v40 = vadd.f32 %v932_v26, %v710_v36 }
 0x100   : > { %v2861_v16 = vpop.f32.mrf.mxu0  ;;  %v3820_v27 = vpop.f32.mrf.mxu1 }
 0x101   : > { %v3822_v28 = vadd.f32 %v2861_v16, %v725_v43 }
 0x102   : > { %v942_v9 = vpop.f32.mrf.mxu0  ;;  %v3824_v10 = vpop.f32.mrf.mxu1 }
 0x103   : > { %v3826_v14 = vadd.f32 %v942_v9, %v720_v50 }
 0x104   : > { %v2864_v12 = vpop.f32.mrf.mxu0  ;;  %v3828_v45 = vpop.f32.mrf.mxu1 }
 0x105   : > { %v3830_v15 = vadd.f32 %v2864_v12, %v735_v55 }
 0x106   : > { %v952_v20 = vpop.f32.mrf.mxu0  ;;  %v3832_v24 = vpop.f32.mrf.mxu1 }
 0x107   : > { %v3834_v25 = vadd.f32 %v952_v20, %v730_v60 }
 0x108   : > { %v2867_v30 = vpop.f32.mrf.mxu0  ;;  %v3836_v34 = vpop.f32.mrf.mxu1 }
 0x109   : > { %v3838_v35 = vadd.f32 %v2867_v30, %v745_v63 }
 0x10a   : > { %v962_v36 = vpop.f32.mrf.mxu0  ;;  %v3840_v38 = vpop.f32.mrf.mxu1 }
 0x10b   : > { %v3842_v42 = vadd.f32 %v962_v36, %v740_v8 }
 0x10c   : > { %v2870_v43 = vpop.f32.mrf.mxu0  ;;  %v3844_v44 = vpop.f32.mrf.mxu1 }
 0x10d   : > { %v3846_v46 = vadd.f32 %v2870_v43, %v755_v37 }
 0x10e   : > { %v972_v50 = vpop.f32.mrf.mxu0  ;;  %v3848_v51 = vpop.f32.mrf.mxu1 }
 0x10f   : > { %v3850_v52 = vadd.f32 %v972_v50, %v750_v48 }
 0x110   : > { %v2873_v55 = vpop.f32.mrf.mxu0  ;;  %v3852_v58 = vpop.f32.mrf.mxu1 }
 0x111   : > { %v3854_v59 = vadd.f32 %v2873_v55, %v765_v19 }
 0x112   : > { %v982_v60 = vpop.f32.mrf.mxu0  ;;  %v3856_v61 = vpop.f32.mrf.mxu1 }
 0x113   : > { %v3858_v62 = vadd.f32 %v982_v60, %v760_v33 }
 0x114   : > { %v2876_v63 = vpop.f32.mrf.mxu0  ;;  %v3860_v0 = vpop.f32.mrf.mxu1 }
 0x115   : > { %v3862_v1 = vadd.f32 %v2876_v63, %v775_v54 }
 0x116   : > { %v992_v8 = vpop.f32.mrf.mxu0  ;;  %v3864_v18 = vpop.f32.mrf.mxu1 }
 0x117   : > { %v3866_v31 = vadd.f32 %v992_v8, %v770_v2 }
 0x118   : > { %v2879_v37 = vpop.f32.mrf.mxu0  ;;  %v3868_v39 = vpop.f32.mrf.mxu1 }
 0x119   : > { %4135 = vst [vmem:[#allocation2_spill] sm:$0xff] %v3868_v39  ;;  %v3870_v47 = vadd.f32 %v2879_v37, %v785_v49 }
 0x11a   : > { %v1002_v48 = vpop.f32.mrf.mxu0  ;;  %v2936_v4 = vpop.f32.mrf.mxu1 }
 0x11b   : > { %v3872_v6 = vadd.f32 %v1002_v48, %v780_v11 }
 0x11c   : > { %v2910_v19 = vpop.f32.mrf.mxu0  ;;  %v1455_v21 = vpop.f32.mrf.mxu1 }
 0x11d   : > { %4136 = vst [vmem:[#allocation3_spill] sm:$0xff] %v3872_v6  ;;  %v1184_v6 = vadd.f32 %v3810_v17, %v3814_v57 }
 0x11e   : > { %v1280_v29 = vpop.f32.mrf.mxu0  ;;  %v3874_v33 = vpop.f32.mrf.mxu1 }
 0x120   : > { %v2913_v53 = vpop.f32.mrf.mxu0  ;;  %v3876_v5 = vpop.f32.mrf.mxu1 }
 0x122   : > { %v1290_v54 = vpop.f32.mrf.mxu0  ;;  %v3878_v41 = vpop.f32.mrf.mxu1 }
 0x124   : > { %v2916_v56 = vpop.f32.mrf.mxu0  ;;  %v3880_v2 = vpop.f32.mrf.mxu1 }
 0x126   : > { %v1300_v3 = vpop.f32.mrf.mxu0  ;;  %v3882_v7 = vpop.f32.mrf.mxu1 }
 0x127   : > { %4137 = vst [vmem:[#allocation4_spill] sm:$0xff] %v3882_v7 }
 0x128   : > { %v3884_v49 = vpop.f32.mrf.mxu0  ;;  %v3886_v13 = vpop.f32.mrf.mxu1 }
 0x129   : > { %4138 = vst [vmem:[#allocation5_spill] sm:$0xff] %v3886_v13 }
 0x12a   : > { %v3888_v11 = vpop.f32.mrf.mxu0  ;;  %v3890_v22 = vpop.f32.mrf.mxu1 }
 0x12b   : > { %4139 = vst [vmem:[#allocation6_spill] sm:$0xff] %v3890_v22 }
 0x12c   : > { %v3892_v26 = vpop.f32.mrf.mxu0  ;;  %v3894_v16 = vpop.f32.mrf.mxu1 }
 0x12d   : > { %4140 = vst [vmem:[#allocation7_spill] sm:$0xff] %v3894_v16 }
 0x12e   : > { %v3896_v9 = vpop.f32.mrf.mxu0  ;;  %v3898_v12 = vpop.f32.mrf.mxu1 }
 0x12f   : > { %4141 = vst [vmem:[#allocation8_spill] sm:$0xff] %v3898_v12 }
 0x130   : > { %v3900_v20 = vpop.f32.mrf.mxu0  ;;  %v3902_v30 = vpop.f32.mrf.mxu1 }
 0x131   : > { %4142 = vst [vmem:[#allocation9_spill] sm:$0xff] %v3900_v20  ;;  %4143 = vst [vmem:[#allocation10_spill] sm:$0xff] %v3902_v30 }
 0x132   : > { %v3904_v36 = vpop.f32.mrf.mxu0  ;;  %v3906_v43 = vpop.f32.mrf.mxu1 }
 0x133   : > { %4144 = vst [vmem:[#allocation11_spill] sm:$0xff] %v3904_v36  ;;  %4145 = vst [vmem:[#allocation12_spill] sm:$0xff] %v3906_v43 }
 0x134   : > { %v3908_v50 = vpop.f32.mrf.mxu0  ;;  %v3910_v55 = vpop.f32.mrf.mxu1 }
 0x135   : > { %4146 = vst [vmem:[#allocation13_spill] sm:$0xff] %v3908_v50  ;;  %4147 = vst [vmem:[#allocation14_spill] sm:$0xff] %v3910_v55 }
 0x136   : > { %v3912_v60 = vpop.f32.mrf.mxu0  ;;  %v3914_v63 = vpop.f32.mrf.mxu1 }
 0x137   : > { %4148 = vst [vmem:[#allocation15_spill] sm:$0xff] %v3912_v60  ;;  %4149 = vst [vmem:[#allocation16_spill] sm:$0xff] %v3914_v63 }
 0x138   : > { %v3916_v8 = vpop.f32.mrf.mxu0  ;;  %v3918_v37 = vpop.f32.mrf.mxu1 }
 0x139   : > { %4150 = vst [vmem:[#allocation17_spill] sm:$0xff] %v3916_v8  ;;  %4151 = vst [vmem:[#allocation18_spill] sm:$0xff] %v3918_v37 }
 0x13a   : > { %v3920_v48 = vpop.f32.mrf.mxu0  ;;  %v2988_v12 = vpop.f32.mrf.mxu1 }
 0x13b   : > { %4152 = vst [vmem:[#allocation19_spill] sm:$0xff] %v3920_v48 }
 0x13c   : > { %v2962_v30 = vpop.f32.mrf.mxu0  ;;  %v1803_v36 = vpop.f32.mrf.mxu1 }
 0x13e   : > { %v1627_v16 = vpop.f32.mrf.mxu0  ;;  %v2991_v22 = vpop.f32.mrf.mxu1 }
 0x140   : > { %v2965_v20 = vpop.f32.mrf.mxu0  ;;  %v3922_v13 = vpop.f32.mrf.mxu1 }
 0x141   : > { %4153 = vst [vmem:[#allocation20_spill] sm:$0xff] %v3922_v13  ;;  %v1183_v13 = vadd.f32 %v3812_v23, %v3818_v40 }
 0x142   : > { %v1637_v43 = vpop.f32.mrf.mxu0  ;;  %v3928_v63 = vpop.f32.mrf.mxu1 }
 0x143   : > { %4156 = vst [vmem:[#allocation23_spill] sm:$0xff] %v3928_v63 }
 0x144   : > { %v2968_v50 = vpop.f32.mrf.mxu0  ;;  %v3934_v48 = vpop.f32.mrf.mxu1 }
 0x145   : > { %4159 = vst [vmem:[#allocation26_spill] sm:$0xff] %v3934_v48 }
 0x146   : > { %v3924_v55 = vpop.f32.mrf.mxu0 }
 0x147   : > { %4154 = vst [vmem:[#allocation21_spill] sm:$0xff] %v3924_v55  ;;  %v1360_v55 = vadd.f32 %v2910_v19, %v1184_v6 }
 0x148   : > { %v3926_v60 = vpop.f32.mrf.mxu0 }
 0x149   : > { %4155 = vst [vmem:[#allocation22_spill] sm:$0xff] %v3926_v60  ;;  %v3944_v60 = vpop.f32.mrf.mxu1  ;;  %v1535_v17 = vadd.f32 %v2936_v4, %v1360_v55  ;;  %v1190_v4 = vadd.f32 %v3832_v24, %v3838_v35  ;;  %v1194_v24 = vadd.f32 %v3848_v51, %v3854_v59  ;;  %v1196_v51 = vadd.f32 %v3856_v61, %v3862_v1 }
 0x14a   : > { %v3930_v8 = vpop.f32.mrf.mxu0 }
 0x14b   : > { %4157 = vst [vmem:[#allocation24_spill] sm:$0xff] %v3930_v8  ;;  %v1359_v8 = vadd.f32 %v1280_v29, %v1183_v13  ;;  %v3956_v23 = vpop.f32.mrf.mxu1 }
 0x14c   : > { %v3932_v37 = vpop.f32.mrf.mxu0 }
 0x14d   : > { %4158 = vst [vmem:[#allocation25_spill] sm:$0xff] %v3932_v37  ;;  %v1186_v37 = vadd.f32 %v3816_v32, %v3822_v28  ;;  %v1534_v6 = vadd.f32 %v1455_v21, %v1359_v8  ;;  %v1187_v32 = vadd.f32 %v3828_v45, %v3834_v25  ;;  %v1192_v45 = vadd.f32 %v3840_v38, %v3846_v46  ;;  %v3986_v38 = vld [vmem:[%s4131_s3] ss:$0 sm:$0xff] }
 0x14e   : > { %v3936_v39 = vpop.f32.mrf.mxu0  ;;  %v1366_v46 = vadd.f32 %v3884_v49, %v1190_v4 }
 0x14f   : > { %4160 = vst [vmem:[#allocation27_spill] sm:$0xff] %v3936_v39  ;;  %v1185_v39 = vadd.f32 %v3820_v27, %v3826_v14  ;;  %v1362_v57 = vadd.f32 %v2913_v53, %v1186_v37  ;;  %v1706_v14 = vadd.f32 %v1627_v16, %v1534_v6  ;;  %v3969_v53 = vpop.f32.mrf.mxu1  ;;  %v1198_v16 = vadd.f32 %v3864_v18, %v3870_v47  ;;  %v4169_v18 = vld [vmem:[#allocation23_spill] sm:$0xff] }
 0x150   : > { %v3940_v7 = vpop.f32.mrf.mxu0  ;;  %v1368_v61 = vadd.f32 %v3892_v26, %v1192_v45  ;;  %v4174_v45 = vld [vmem:[#allocation26_spill] sm:$0xff] }
 0x151   : > { %4161 = vst [vmem:[#allocation28_spill] sm:$0xff] %v3940_v7  ;;  %v1188_v7 = vadd.f32 %v3824_v10, %v3830_v15  ;;  %v1361_v19 = vadd.f32 %v1290_v54, %v1185_v39  ;;  %v1537_v27 = vadd.f32 %v3874_v33, %v1362_v57  ;;  %v1189_v10 = vadd.f32 %v3836_v34, %v3842_v42 }
 0x152   : > { %v3946_v63 = vpop.f32.mrf.mxu0  ;;  %v1363_v15 = vadd.f32 %v1300_v3, %v1187_v32  ;;  %v1191_v33 = vadd.f32 %v3844_v44, %v3850_v52  ;;  %v1193_v34 = vadd.f32 %v3852_v58, %v3858_v62  ;;  %v3993_v62 = vpop.f32.mrf.mxu1  ;;  %v1195_v3 = vadd.f32 %v3860_v0, %v3866_v31 }
 0x153   : > { %4162 = vst [vmem:[#allocation29_spill] sm:$0xff] %v3946_v63  ;;  %v1707_v63 = vadd.f32 %v2962_v30, %v1535_v17  ;;  %v1364_v28 = vadd.f32 %v2916_v56, %v1188_v7  ;;  %v1536_v25 = vadd.f32 %v3876_v5, %v1361_v19  ;;  %v1709_v54 = vadd.f32 %v2965_v20, %v1537_v27  ;;  %v4164_v20 = vld [vmem:[#allocation4_spill] sm:$0xff]  ;;  %v4170_v17 = vld [vmem:[#allocation22_spill] sm:$0xff] }
 0x154   : > { %v3950_v48 = vpop.f32.mrf.mxu0  ;;  %v1882_v5 = vadd.f32 %v1803_v36, %v1706_v14  ;;  %v1538_v52 = vadd.f32 %v3880_v2, %v1363_v15  ;;  %v1365_v58 = vadd.f32 %v3888_v11, %v1189_v10  ;;  %v1367_v1 = vadd.f32 %v3896_v9, %v1191_v33  ;;  %v4163_v2 = vld [vmem:[#allocation21_spill] sm:$0xff]  ;;  %v4165_v36 = vld [vmem:[#allocation20_spill] sm:$0xff]  ;;  %v4010_v26 = vpop.f32.mrf.mxu1  ;;  %v4173_v10 = vld [vmem:[#allocation7_spill] sm:$0xff] }
 0x155   : > { %v1883_v21 = vadd.f32 %v2988_v12, %v1707_v63  ;;  %v1539_v35 = vadd.f32 %v3878_v41, %v1364_v28  ;;  %v1708_v56 = vadd.f32 %v1637_v43, %v1536_v25  ;;  %v1885_v7 = vadd.f32 %v2991_v22, %v1709_v54  ;;  %v4166_v22 = vld [vmem:[#allocation3_spill] sm:$0xff]  ;;  %v4168_v63 = vld [vmem:[#allocation5_spill] sm:$0xff]  ;;  %v4171_v28 = vld [vmem:[#allocation6_spill] sm:$0xff] }
 0x156   : > { %v3958_v40 = vpop.f32.mrf.mxu0  ;;  %v1710_v11 = vadd.f32 %v4163_v2, %v1538_v52  ;;  %v1541_v30 = vadd.f32 %v4164_v20, %v1366_v46  ;;  %v1540_v8 = vadd.f32 %v4168_v63, %v1365_v58  ;;  %v1543_v27 = vadd.f32 %v4171_v28, %v1368_v61  ;;  %v4172_v14 = vld [vmem:[#allocation9_spill] sm:$0xff]  ;;  %v4175_v54 = vld [vmem:[#allocation24_spill] sm:$0xff]  ;;  %v1853_v58 = vpop.f32.mrf.mxu1 }
 0x157   : > { %v1711_v59 = vadd.f32 %v2968_v50, %v1539_v35  ;;  %v1884_v43 = vadd.f32 %v4165_v36, %v1708_v56  ;;  %v4167_v50 = vld [vmem:[#allocation2_spill] sm:$0xff]  ;;  %v1370_v4 = vadd.f32 %v4172_v14, %v1194_v24  ;;  %v1542_v15 = vadd.f32 %v4173_v10, %v1367_v1  ;;  %v4178_v2 = vld [vmem:[#allocation8_spill] sm:$0xff]  ;;  %v4181_v36 = vld [vmem:[#allocation27_spill] sm:$0xff] }
 0x158   : > { %v3962_v29 = vpop.f32.mrf.mxu0  ;;  %v1197_v55 = vadd.f32 %v4167_v50, %v4166_v22  ;;  %v1713_v57 = vadd.f32 %v4170_v17, %v1541_v30  ;;  %v1886_v25 = vadd.f32 %v4174_v45, %v1710_v11  ;;  %v1712_v33 = vadd.f32 %v4175_v54, %v1540_v8  ;;  %v4180_v30 = vld [vmem:[#allocation15_spill] sm:$0xff]  ;;  %v4182_v50 = vld [vmem:[#allocation10_spill] sm:$0xff]  ;;  %v4185_v28 = vld [vmem:[#allocation17_spill] sm:$0xff] }
 0x159   : > { %v1887_v47 = vadd.f32 %v4169_v18, %v1711_v59  ;;  %v1545_v11 = vadd.f32 %v4178_v2, %v1370_v4  ;;  %v3006_v18 = vpop.f32.mrf.mxu1  ;;  %v4186_v14 = vld [vmem:[#allocation14_spill] sm:$0xff]  ;;  %v4188_v54 = vld [vmem:[#allocation19_spill] sm:$0xff] }
 0x15a   : > { %v3971_v39 = vpop.f32.mrf.mxu0  ;;  %v1889_v24 = vadd.f32 %v3944_v60, %v1713_v57 }
 0x15c   : > { %v3014_v42 = vpop.f32.mrf.mxu0 }
 0x15d   : > { %v2058_v44 = vadd.f32 %v3014_v42, %v1883_v21 }
 0x15e   : > { %v1978_v41 = vpop.f32.mrf.mxu0 }
 0x15f   : > { %v2081_v49 = vadd.f32 %v3986_v38, %v2058_v44  ;;  %v2057_v13 = vadd.f32 %v1978_v41, %v1882_v5  ;;  %v4176_v5 = vld [vmem:[#allocation11_spill] sm:$0xff]  ;;  %v4177_v44 = vld [vmem:[#allocation25_spill] sm:$0xff] }
 0x160   : > { %v3017_v12 = vpop.f32.mrf.mxu0  ;;  %v1369_v56 = vadd.f32 %v4176_v5, %v1193_v34  ;;  %v1715_v52 = vadd.f32 %v4177_v44, %v1543_v27  ;;  %v1371_v34 = vadd.f32 %v4180_v30, %v1195_v3  ;;  %v4183_v3 = vld [vmem:[#allocation28_spill] sm:$0xff]  ;;  %v1374_v27 = vadd.f32 %v4185_v28, %v1198_v16 }
 0x161   : > { %v2080_v0 = vadd.f32 %v3986_v38, %v2057_v13  ;;  %v2060_v31 = vadd.f32 %v3017_v12, %v1885_v7  ;;  %v2097_v9 = vmul.f32 0.1, %v2081_v49  ;;  %v4179_v12 = vld [vmem:[#allocation13_spill] sm:$0xff] }
 0x162   : > { %v1988_v37 = vpop.f32.mrf.mxu0  ;;  %v1372_v20 = vadd.f32 %v4179_v12, %v1196_v51  ;;  %v1544_v63 = vadd.f32 %v4182_v50, %v1369_v56  ;;  %v1891_v8 = vadd.f32 %v3969_v53, %v1715_v52  ;;  %v1546_v4 = vadd.f32 %v4186_v14, %v1371_v34 }
 0x163   : > { %v2096_v6 = vmul.f32 0.1, %v2080_v0  ;;  %v2083_v19 = vadd.f32 %v3986_v38, %v2060_v31  ;;  %v2059_v32 = vadd.f32 %v1988_v37, %v1884_v43  ;;  %v2113_v59 = vmax.f32 %v2081_v49, %v2097_v9 }
 0x164   : > { %v3020_v21 = vpop.f32.mrf.mxu0  ;;  %v1714_v43 = vadd.f32 %v4181_v36, %v1542_v15  ;;  %v1888_v49 = vadd.f32 %v3956_v23, %v1712_v33  ;;  %v1717_v37 = vadd.f32 %v4183_v3, %v1545_v11  ;;  %v4184_v23 = vld [vmem:[#allocation12_spill] sm:$0xff]  ;;  %v1373_v33 = vadd.f32 %v4188_v54, %v1197_v55 }
 0x165   : > { %v2112_v35 = vmax.f32 %v2080_v0, %v2096_v6  ;;  %v2082_v42 = vadd.f32 %v3986_v38, %v2059_v32  ;;  %v2062_v46 = vadd.f32 %v3020_v21, %v1887_v47  ;;  %v2099_v41 = vmul.f32 0.1, %v2083_v19 }
 0x166   : > { %v1998_v7 = vpop.f32.mrf.mxu0  ;;  %v1547_v32 = vadd.f32 %v4184_v23, %v1372_v20  ;;  %v1890_v53 = vadd.f32 %v3993_v62, %v1714_v43  ;;  %v1893_v56 = vadd.f32 %v4010_v26, %v1717_v37 }
 0x167   : > { %v2098_v13 = vmul.f32 0.1, %v2082_v42  ;;  %v2085_v61 = vadd.f32 %v3986_v38, %v2062_v46  ;;  %v2061_v1 = vadd.f32 %v1998_v7, %v1886_v25  ;;  %3038 = vmatprep.mubr.msk.f32.mxu1 %vm2136_vm4, %v2112_v35  ;;  %v2115_v47 = vmax.f32 %v2083_v19, %v2099_v41  ;;  %v4187_v19 = vld [vmem:[#allocation29_spill] sm:$0xff] }
 0x168   : > { %v3023_v0 = vpop.f32.mrf.mxu0  ;;  %3039 = vmatmul.mubr.msk.f32.vlgmr.msra.gmra.mxu1 %vm2136_vm4, %v2113_v59  ;;  %v1716_v15 = vadd.f32 %v4187_v19, %v1544_v63  ;;  %v1719_v35 = vadd.f32 %v3950_v48, %v1547_v32  ;;  %v4189_v59 = vld [vmem:[#allocation16_spill] sm:$0xff]  ;;  %v1718_v7 = vadd.f32 %v3958_v40, %v1546_v4 }
 0x169   : > { %v2114_v60 = vmax.f32 %v2082_v42, %v2098_v13  ;;  %v2084_v31 = vadd.f32 %v3986_v38, %v2061_v1  ;;  %v2064_v22 = vadd.f32 %v3023_v0, %v1889_v24  ;;  %v2101_v51 = vmul.f32 0.1, %v2085_v61  ;;  %v1863_v42 = vpop.f32.mrf.mxu1  ;;  %v4190_v1 = vld [vmem:[#allocation18_spill] sm:$0xff] }
 0x16a   : > { %v2008_v9 = vpop.f32.mrf.mxu0  ;;  %v1549_v41 = vadd.f32 %v4189_v59, %v1374_v27  ;;  %v1892_v48 = vadd.f32 %v1853_v58, %v1716_v15  ;;  %v1548_v26 = vadd.f32 %v4190_v1, %v1373_v33  ;;  %v1895_v2 = vadd.f32 %v3006_v18, %v1719_v35 }
 0x16b   : > { %v2100_v17 = vmul.f32 0.1, %v2084_v31  ;;  %v2087_v57 = vadd.f32 %v3986_v38, %v2064_v22  ;;  %v2063_v6 = vadd.f32 %v2008_v9, %v1888_v49  ;;  %3041 = vmatprep.mubr.msk.f32.mxu1 %vm2136_vm4, %v2114_v60  ;;  %v2117_v46 = vmax.f32 %v2085_v61, %v2101_v51  ;;  %v3009_v11 = vpop.f32.mrf.mxu1 }
 0x16c   : > { %v3026_v10 = vpop.f32.mrf.mxu0  ;;  %3042 = vmatmul.mubr.msk.f32.gmra.mxu1 %vm2136_vm4, %v2115_v47  ;;  %v1721_v34 = vadd.f32 %v3962_v29, %v1549_v41  ;;  %v1894_v58 = vadd.f32 %v1863_v42, %v1718_v7  ;;  %v1720_v49 = vadd.f32 %v3971_v39, %v1548_v26 }
 0x16d   : > { %v2116_v45 = vmax.f32 %v2084_v31, %v2100_v17  ;;  %v2086_v25 = vadd.f32 %v3986_v38, %v2063_v6  ;;  %v2066_v21 = vadd.f32 %v3026_v10, %v1891_v8  ;;  %v2103_v16 = vmul.f32 0.1, %v2087_v57  ;;  %v1873_v50 = vpop.f32.mrf.mxu1 }
 0x16e   : > { %v2018_v5 = vpop.f32.mrf.mxu0  ;;  %v1897_v18 = vadd.f32 %v3009_v11, %v1721_v34  ;;  %v1896_v37 = vadd.f32 %v1873_v50, %v1720_v49 }
 0x16f   : > { %v2102_v62 = vmul.f32 0.1, %v2086_v25  ;;  %v2089_v44 = vadd.f32 %v3986_v38, %v2066_v21  ;;  %v2065_v52 = vadd.f32 %v2018_v5, %v1890_v53  ;;  %3044 = vmatprep.mubr.msk.f32.mxu1 %vm2136_vm4, %v2116_v45  ;;  %v2119_v12 = vmax.f32 %v2087_v57, %v2103_v16 }
 0x170   : > { %v3029_v24 = vpop.f32.mrf.mxu0  ;;  %3045 = vmatmul.mubr.msk.f32.gmra.mxu1 %vm2136_vm4, %v2117_v46 }
 0x171   : > { %v2118_v55 = vmax.f32 %v2086_v25, %v2102_v62  ;;  %v2088_v13 = vadd.f32 %v3986_v38, %v2065_v52  ;;  %v2068_v61 = vadd.f32 %v3029_v24, %v1893_v56  ;;  %v2105_v20 = vmul.f32 0.1, %v2089_v44 }
 0x172   : > { %v2028_v30 = vpop.f32.mrf.mxu0 }
 0x173   : > { %v2104_v36 = vmul.f32 0.1, %v2088_v13  ;;  %v2091_v40 = vadd.f32 %v3986_v38, %v2068_v61  ;;  %v2067_v43 = vadd.f32 %v2028_v30, %v1892_v48  ;;  %3047 = vmatprep.mubr.msk.f32.mxu1 %vm2136_vm4, %v2118_v55  ;;  %v2121_v63 = vmax.f32 %v2089_v44, %v2105_v20 }
 0x174   : > { %v3032_v0 = vpop.f32.mrf.mxu0  ;;  %3048 = vmatmul.mubr.msk.f32.gmra.mxu1 %vm2136_vm4, %v2119_v12 }
 0x175   : > { %v2120_v60 = vmax.f32 %v2088_v13, %v2104_v36  ;;  %v2090_v31 = vadd.f32 %v3986_v38, %v2067_v43  ;;  %v2070_v22 = vadd.f32 %v3032_v0, %v1895_v2  ;;  %v2107_v8 = vmul.f32 0.1, %v2091_v40 }
 0x176   : > { %v2038_v29 = vpop.f32.mrf.mxu0 }
 0x177   : > { %v2106_v47 = vmul.f32 0.1, %v2090_v31  ;;  %v2093_v51 = vadd.f32 %v3986_v38, %v2070_v22  ;;  %v2069_v9 = vadd.f32 %v2038_v29, %v1894_v58  ;;  %3050 = vmatprep.mubr.msk.f32.mxu1 %vm2136_vm4, %v2120_v60  ;;  %v2123_v6 = vmax.f32 %v2091_v40, %v2107_v8 }
 0x178   : > { %v3035_v3 = vpop.f32.mrf.mxu0  ;;  %3051 = vmatmul.mubr.msk.f32.gmra.mxu1 %vm2136_vm4, %v2121_v63 }
 0x179   : > { %v2122_v39 = vmax.f32 %v2090_v31, %v2106_v47  ;;  %v2092_v17 = vadd.f32 %v3986_v38, %v2069_v9  ;;  %v2072_v57 = vadd.f32 %v3035_v3, %v1897_v18  ;;  %v2109_v23 = vmul.f32 0.1, %v2093_v51 }
 0x17a   : > { %v2048_v32 = vpop.f32.mrf.mxu0 }
 0x17b   : > { %v2108_v28 = vmul.f32 0.1, %v2092_v17  ;;  %v2095_v27 = vadd.f32 %v3986_v38, %v2072_v57  ;;  %v2071_v14 = vadd.f32 %v2048_v32, %v1896_v37  ;;  %3053 = vmatprep.mubr.msk.f32.mxu1 %vm2136_vm4, %v2122_v39  ;;  %v2125_v10 = vmax.f32 %v2093_v51, %v2109_v23 }
 0x17c   : > { %3054 = vmatmul.mubr.msk.f32.gmra.mxu1 %vm2136_vm4, %v2123_v6 }
 0x17d   : > { %v2124_v4 = vmax.f32 %v2092_v17, %v2108_v28  ;;  %v2094_v53 = vadd.f32 %v3986_v38, %v2071_v14  ;;  %v2111_v19 = vmul.f32 0.1, %v2095_v27  ;;  %v2613_v38 = vld [vmem:[%s4133_s5] ss:$0 sm:$0xff] }
 0x17f   : > { %v2110_v15 = vmul.f32 0.1, %v2094_v53  ;;  %3056 = vmatprep.mubr.msk.f32.mxu1 %vm2136_vm4, %v2124_v4  ;;  %v2127_v25 = vmax.f32 %v2095_v27, %v2111_v19 }
 0x180   : > { %3057 = vmatmul.mubr.msk.f32.gmra.mxu1 %vm2136_vm4, %v2125_v10 }
 0x181   : > { %v2126_v45 = vmax.f32 %v2094_v53, %v2110_v15 }
 0x183   : > { %3059 = vmatprep.mubr.msk.f32.mxu1 %vm2136_vm4, %v2126_v45 }
 0x184   : > { %3060 = vmatmul.mubr.msk.f32.gmra.mxu1 %vm2136_vm4, %v2127_v25 }
 0x228   : > { %v3040_v21 = vpop.f32.mrf.mxu1 }
 0x229   : > { %v2257_v54 = vadd.f32 %v3040_v21, %v2613_v38 }
 0x22a   : > { %v2251_v33 = vpop.f32.mrf.mxu1 }
 0x22b   : > { %2331 = vst.msk [vmem:[%s4079_s7 + $0x8] sm:$0xff] %vm2136_vm4, %v2257_v54  ;;  %v2252_v35 = vadd.f32 %v2613_v38, %v2251_v33 }
 0x22c   : > { %v3043_v42 = vpop.f32.mrf.mxu1 }
 0x22d   : > { %2330 = vst.msk [vmem:[%s4079_s7] sm:$0xff] %vm2136_vm4, %v2252_v35  ;;  %v2267_v46 = vadd.f32 %v3043_v42, %v2613_v38 }
 0x22e   : > { %v2261_v16 = vpop.f32.mrf.mxu1 }
 0x22f   : > { %2333 = vst.msk [vmem:[%s4079_s7 + $0x18] sm:$0xff] %vm2136_vm4, %v2267_v46  ;;  %v2262_v5 = vadd.f32 %v2613_v38, %v2261_v16 }
 0x230   : > { %v3046_v56 = vpop.f32.mrf.mxu1 }
 0x231   : > { %2332 = vst.msk [vmem:[%s4079_s7 + $0x10] sm:$0xff] %vm2136_vm4, %v2262_v5  ;;  %v2277_v62 = vadd.f32 %v3046_v56, %v2613_v38 }
 0x232   : > { %v2271_v44 = vpop.f32.mrf.mxu1 }
 0x233   : > { %2335 = vst.msk [vmem:[%s4079_s7 + $0x28] sm:$0xff] %vm2136_vm4, %v2277_v62  ;;  %v2272_v52 = vadd.f32 %v2613_v38, %v2271_v44 }
 0x234   : > { %v3049_v59 = vpop.f32.mrf.mxu1 }
 0x235   : > { %2334 = vst.msk [vmem:[%s4079_s7 + $0x20] sm:$0xff] %vm2136_vm4, %v2272_v52  ;;  %v2287_v41 = vadd.f32 %v3049_v59, %v2613_v38 }
 0x236   : > { %v2281_v7 = vpop.f32.mrf.mxu1 }
 0x237   : > { %2337 = vst.msk [vmem:[%s4079_s7 + $0x38] sm:$0xff] %vm2136_vm4, %v2287_v41  ;;  %v2282_v24 = vadd.f32 %v2613_v38, %v2281_v7 }
 0x238   : > { %v3052_v48 = vpop.f32.mrf.mxu1 }
 0x239   : > { %2336 = vst.msk [vmem:[%s4079_s7 + $0x30] sm:$0xff] %vm2136_vm4, %v2282_v24  ;;  %v2297_v55 = vadd.f32 %v3052_v48, %v2613_v38 }
 0x23a   : > { %v2291_v13 = vpop.f32.mrf.mxu1 }
 0x23b   : > { %2339 = vst.msk [vmem:[%s4079_s7 + $0x48] sm:$0xff] %vm2136_vm4, %v2297_v55  ;;  %v2292_v61 = vadd.f32 %v2613_v38, %v2291_v13 }
 0x23c   : > { %v3055_v1 = vpop.f32.mrf.mxu1 }
 0x23d   : > { %2338 = vst.msk [vmem:[%s4079_s7 + $0x40] sm:$0xff] %vm2136_vm4, %v2292_v61  ;;  %v2307_v26 = vadd.f32 %v3055_v1, %v2613_v38 }
 0x23e   : > { %v2301_v2 = vpop.f32.mrf.mxu1 }
 0x23f   : > { %2341 = vst.msk [vmem:[%s4079_s7 + $0x58] sm:$0xff] %vm2136_vm4, %v2307_v26  ;;  %v2302_v11 = vadd.f32 %v2613_v38, %v2301_v2 }
 0x240   : > { %v3058_v12 = vpop.f32.mrf.mxu1 }
 0x241   : > { %2340 = vst.msk [vmem:[%s4079_s7 + $0x50] sm:$0xff] %vm2136_vm4, %v2302_v11  ;;  %v2317_v20 = vadd.f32 %v3058_v12, %v2613_v38 }
 0x242   : > { %v2311_v30 = vpop.f32.mrf.mxu1 }
 0x243   : > { %2343 = vst.msk [vmem:[%s4079_s7 + $0x68] sm:$0xff] %vm2136_vm4, %v2317_v20  ;;  %v2312_v34 = vadd.f32 %v2613_v38, %v2311_v30 }
 0x244   : > { %v3061_v36 = vpop.f32.mrf.mxu1 }
 0x245   : > { %2342 = vst.msk [vmem:[%s4079_s7 + $0x60] sm:$0xff] %vm2136_vm4, %v2312_v34  ;;  %v2327_v40 = vadd.f32 %v3061_v36, %v2613_v38 }
 0x246   : > { %v2321_v43 = vpop.f32.mrf.mxu1 }
 0x247   : > { %2345 = vst.msk [vmem:[%s4079_s7 + $0x78] sm:$0xff] %vm2136_vm4, %v2327_v40  ;;  %v2322_v58 = vadd.f32 %v2613_v38, %v2321_v43 }
 0x249   : > { %2344 = vst.msk [vmem:[%s4079_s7 + $0x70] sm:$0xff] %vm2136_vm4, %v2322_v58 }
 0x24a PF: > { %s16_s25 = sadd.s32 1, %s3142_s25   ;;  %s4191_s21 = smov %s3134_s23 }
 0x24b   : > { %p13_p8 = scmp.ge.s32.totalorder %s16_s25, 6   ;;  %s4192_s22 = smov %s3138_s24 }
 0x24c   : > { %s4193_s23 = smov %s4196_s26  ;;  %s4194_s24 = smov %s4200_s27 }
 0x24d   :  { %15 = sbr.rel (!%p13_p8) target bundleno = 3 (0x3), region = 85 }

</bundles_post_ra>
